<compile_context>
chip_gen: v6e
topology: v6e:2x2x1
jax: 0.10.0
libtpu: 0.0.40
codegen_flags: <defaults>
</compile_context>

<pallas_src>
import functools

import numpy as np
import jax
import jax.numpy as jnp
from jax.experimental import pallas as pl
from jax.experimental.pallas import tpu as pltpu

LANE = 128


def _round_up(x, m):
    return (x + m - 1) // m * m


def _pad2(a, rows, cols):
    return jnp.pad(a, ((0, rows - a.shape[0]), (0, cols - a.shape[1])))


def _masked_log_softmax(z, cout):
    """log_softmax over the real (unpadded) feature lanes only."""
    col = jax.lax.broadcasted_iota(jnp.int32, z.shape, 1)
    valid = col < cout
    zm = jnp.where(valid, z, -jnp.inf)
    m = jnp.max(zm, axis=-1, keepdims=True)
    e = jnp.where(valid, jnp.exp(z - m), 0.0)
    lse = jnp.log(jnp.sum(e, axis=-1, keepdims=True))
    return jnp.where(valid, z - m - lse, 0.0)


# ---------------------------------------------------------------------------
# Fused single-kernel path (small N): adjacency read once, no HBM round-trips.
# ---------------------------------------------------------------------------
def fused_kernel(betas_ref, adj_ref, x_ref, w1_ref, b1_ref, wf1_ref, bf1_ref,
                 w2_ref, b2_ref, wf2_ref, bf2_ref, out_ref, *, cout):
    beta1 = betas_ref[0]
    beta2 = betas_ref[1]
    x = x_ref[...]                                   # (n_p, cin_p) bf16
    adj = adj_ref[...]                               # (n_p, n_p)   bf16
    # layer-1 linears
    xw1 = jnp.dot(x, w1_ref[...],
                  preferred_element_type=jnp.float32).astype(jnp.bfloat16)
    h_fc = jnp.maximum(
        jnp.dot(x, wf1_ref[...], preferred_element_type=jnp.float32)
        + bf1_ref[...], 0.0)                         # relu (+ eval dropout = id)
    # layer-1 aggregation
    h_gcn = jnp.maximum(
        jnp.dot(adj, xw1, preferred_element_type=jnp.float32) + b1_ref[...], 0.0)
    mix = beta1 * h_gcn + (1.0 - beta1) * h_fc       # stacked_l1 sum
    # layer-2 linears
    mw2 = jnp.dot(mix.astype(jnp.bfloat16), w2_ref[...],
                  preferred_element_type=jnp.float32).astype(jnp.bfloat16)
    o_fc = (jnp.dot(h_fc.astype(jnp.bfloat16), wf2_ref[...],
                    preferred_element_type=jnp.float32) + bf2_ref[...])
    # layer-2 aggregation + beta2-mix + masked log_softmax
    z = (beta2 * (jnp.dot(adj, mw2, preferred_element_type=jnp.float32)
                  + b2_ref[...])
         + (1.0 - beta2) * o_fc)
    out_ref[...] = _masked_log_softmax(z, cout)


# ---------------------------------------------------------------------------
# Streamed path, Pass A: pre-aggregation linears over node-row tiles.
# ---------------------------------------------------------------------------
def linears_kernel(x_ref, w1_ref, wf1_ref, bf1_ref, wf2_ref, bf2_ref,
                   xw1_ref, hfc_ref, ofc_ref):
    x = x_ref[...]                                   # (tm, cin_p) bf16
    xw1_ref[...] = jnp.dot(x, w1_ref[...],
                           preferred_element_type=jnp.float32).astype(jnp.bfloat16)
    h_fc = jnp.maximum(
        jnp.dot(x, wf1_ref[...], preferred_element_type=jnp.float32)
        + bf1_ref[...], 0.0)                         # relu (+ eval dropout = id)
    hfc_ref[...] = h_fc.astype(jnp.bfloat16)
    # fc2 has no dependence on the aggregation -> hoisted out of Pass B.
    ofc_ref[...] = (jnp.dot(h_fc.astype(jnp.bfloat16), wf2_ref[...],
                            preferred_element_type=jnp.float32)
                    + bf2_ref[...]).astype(jnp.bfloat16)


# ---------------------------------------------------------------------------
# Streamed path, Pass B: block-sparse layer-1 aggregation + mix + W2.
# ---------------------------------------------------------------------------
def agg1_kernel(blk_ref, cnt_ref, betas_ref, adj_ref, xw1_ref, hfc_ref,
                b1_ref, w2_ref, mw2_ref, acc_ref):
    i = pl.program_id(0)
    k = pl.program_id(1)

    @pl.when(k == 0)
    def _():
        acc_ref[...] = jnp.zeros_like(acc_ref)

    @pl.when(k < cnt_ref[i])                          # skip padded (zero) blocks
    def _():
        acc_ref[...] += jnp.dot(adj_ref[...], xw1_ref[...],
                                preferred_element_type=jnp.float32)

    @pl.when(k == pl.num_programs(1) - 1)
    def _():
        beta1 = betas_ref[0]
        h_gcn = jnp.maximum(acc_ref[...] + b1_ref[...], 0.0)    # bias + relu
        mix = beta1 * h_gcn + (1.0 - beta1) * hfc_ref[...].astype(jnp.float32)
        mw2_ref[...] = jnp.dot(mix.astype(jnp.bfloat16), w2_ref[...],
                               preferred_element_type=jnp.float32).astype(jnp.bfloat16)


# ---------------------------------------------------------------------------
# Streamed path, Pass C: block-sparse layer-2 aggregation + masked log_softmax.
# ---------------------------------------------------------------------------
def agg2_kernel(blk_ref, cnt_ref, betas_ref, adj_ref, mw2_ref, ofc_ref,
                b2_ref, out_ref, acc_ref, *, cout):
    i = pl.program_id(0)
    k = pl.program_id(1)

    @pl.when(k == 0)
    def _():
        acc_ref[...] = jnp.zeros_like(acc_ref)

    @pl.when(k < cnt_ref[i])
    def _():
        acc_ref[...] += jnp.dot(adj_ref[...], mw2_ref[...],
                                preferred_element_type=jnp.float32)

    @pl.when(k == pl.num_programs(1) - 1)
    def _():
        beta2 = betas_ref[1]
        z = (beta2 * (acc_ref[...] + b2_ref[...])
             + (1.0 - beta2) * ofc_ref[...].astype(jnp.float32))
        out_ref[...] = _masked_log_softmax(z, cout)


# ---------------------------------------------------------------------------
# Glue
# ---------------------------------------------------------------------------
def build_normalized_adj(edge_index, num_nodes):
    """Dense D^-1/2 (A + I) D^-1/2, matching PyG GCNConv's gcn_norm (defaults)."""
    src = edge_index[0]
    dst = edge_index[1]
    a = jnp.zeros((num_nodes, num_nodes), dtype=jnp.float32)
    # messages flow src -> dst:  out[dst] += norm * x[src]  =>  A_hat[dst, src]
    a = a.at[dst, src].add(1.0)
    a = a + jnp.eye(num_nodes, dtype=jnp.float32)               # self loops
    deg = jnp.sum(a, axis=1)
    dinv = jnp.where(deg > 0, jax.lax.rsqrt(deg), 0.0)
    return dinv[:, None] * a * dinv[None, :]


def _block_csr(adj_pad, tm, tk):
    """Per row-tile list of nonzero (tm, tk) column blocks of A_hat.

    Returns (blk[gm, max_nnz] int32, cnt[gm] int32, max_nnz). Padded slots
    repeat the last valid block id so Pallas elides the re-DMA.
    Requires concrete (non-traced) adjacency (eager build).
    """
    gm = adj_pad.shape[0] // tm
    gk = adj_pad.shape[1] // tk
    nz = (jnp.abs(adj_pad.astype(jnp.float32))
          .reshape(gm, tm, gk, tk).sum(axis=(1, 3)) > 0)
    nz = np.asarray(jax.device_get(nz))
    cnt = nz.sum(axis=1).astype(np.int32)
    max_nnz = max(int(cnt.max()), 1)
    blk = np.zeros((gm, max_nnz), dtype=np.int32)
    for i in range(gm):
        cols = np.nonzero(nz[i])[0].astype(np.int32)
        if cols.size == 0:
            cols = np.array([min(i, gk - 1)], dtype=np.int32)   # cnt stays 0
        blk[i, :cols.size] = cols
        blk[i, cols.size:] = cols[-1]
    return jnp.asarray(blk), jnp.asarray(cnt), max_nnz


def interlayer_forward(x, edge_index, params, *, max_tile=1024,
                       fused_max_nodes=1024):
    assert max_tile % LANE == 0
    n, cin = x.shape
    h = params["w1"].shape[1]
    cout = params["w2"].shape[1]

    cin_p = _round_up(cin, LANE)
    h_p = _round_up(h, LANE)
    cout_p = _round_up(cout, LANE)

    # TODO(synk): build the block-CSR straight from edge_index for very large N
    # (skip the dense O(N^2) scatter build entirely).
    adj = build_normalized_adj(edge_index, n).astype(jnp.bfloat16)  # cast pre-pad

    w1_b = _pad2(params["w1"], cin_p, h_p).astype(jnp.bfloat16)
    wf1_b = _pad2(params["wf1"], cin_p, h_p).astype(jnp.bfloat16)
    w2_b = _pad2(params["w2"], h_p, cout_p).astype(jnp.bfloat16)
    wf2_b = _pad2(params["wf2"], h_p, cout_p).astype(jnp.bfloat16)
    b1_p = _pad2(params["b1"], 1, h_p)
    bf1_p = _pad2(params["bf1"], 1, h_p)
    b2_p = _pad2(params["b2"], 1, cout_p)
    bf2_p = _pad2(params["bf2"], 1, cout_p)
    betas = jnp.array([params["beta1"], params["beta2"]], dtype=jnp.float32)

    n_p = _round_up(max(n, LANE), LANE)

    # ------------------------------------------------------------------
    # Fused path: whole graph resident in VMEM, adjacency DMA'd once.
    # (On v7x this uses one TC; lower fused_max_nodes to force the streamed
    #  path with gm>=2 if both TCs are needed for small graphs.)
    # ------------------------------------------------------------------
    if n_p <= fused_max_nodes:
        adj_b = _pad2(adj, n_p, n_p)
        x_b = _pad2(x, n_p, cin_p).astype(jnp.bfloat16)
        out_full = pl.pallas_call(
            functools.partial(fused_kernel, cout=cout),
            out_shape=jax.ShapeDtypeStruct((n_p, cout_p), jnp.float32),
            grid=(1,),
            in_specs=[
                pl.BlockSpec(memory_space=pltpu.MemorySpace.SMEM),  # betas
                pl.BlockSpec((n_p, n_p), lambda i: (0, 0)),         # A_hat
                pl.BlockSpec((n_p, cin_p), lambda i: (0, 0)),        # x
                pl.BlockSpec((cin_p, h_p), lambda i: (0, 0)),        # W1
                pl.BlockSpec((1, h_p), lambda i: (0, 0)),            # b1
                pl.BlockSpec((cin_p, h_p), lambda i: (0, 0)),        # Wf1
                pl.BlockSpec((1, h_p), lambda i: (0, 0)),            # bf1
                pl.BlockSpec((h_p, cout_p), lambda i: (0, 0)),       # W2
                pl.BlockSpec((1, cout_p), lambda i: (0, 0)),         # b2
                pl.BlockSpec((h_p, cout_p), lambda i: (0, 0)),       # Wf2
                pl.BlockSpec((1, cout_p), lambda i: (0, 0)),         # bf2
            ],
            out_specs=pl.BlockSpec((n_p, cout_p), lambda i: (0, 0)),
            compiler_params=pltpu.CompilerParams(
                dimension_semantics=("arbitrary",),
                vmem_limit_bytes=48 * 1024 * 1024),
        )(betas, adj_b, x_b, w1_b, b1_p, wf1_b, bf1_p, w2_b, b2_p, wf2_b, bf2_p)
        return out_full[:n, :cout]

    # ------------------------------------------------------------------
    # Streamed block-sparse path.
    # ------------------------------------------------------------------
    tk = min(max_tile, n_p)                 # lane dim of adj tile (mult of 128)
    n_p = _round_up(n, tk)
    gk = n_p // tk
    tm = tk
    if n_p // tm < 2 and n_p >= 2 * LANE:   # keep >=2 row blocks (v7x 2 TCs)
        tm = n_p // 2
    gm = n_p // tm

    adj_b = _pad2(adj, n_p, n_p)
    x_b = _pad2(x, n_p, cin_p).astype(jnp.bfloat16)

    blk, cnt, max_nnz = _block_csr(adj_b, tm, tk)
    nnz_blocks = int(np.asarray(jax.device_get(cnt)).sum())

    cparams_rows = pltpu.CompilerParams(dimension_semantics=("parallel",))
    # Working set at tm=tk=1024 is ~10 MiB; 64 MiB limit leaves headroom on
    # 128 MiB v5e/v6e and stays within v7x's 64 MiB physical VMEM.
    cparams_agg = pltpu.CompilerParams(
        dimension_semantics=("parallel", "arbitrary"),
        vmem_limit_bytes=64 * 1024 * 1024)

    # ---- Pass A: xw1, hfc, ofc over row tiles ----
    xw1, hfc, ofc = pl.pallas_call(
        linears_kernel,
        out_shape=(jax.ShapeDtypeStruct((n_p, h_p), jnp.bfloat16),
                   jax.ShapeDtypeStruct((n_p, h_p), jnp.bfloat16),
                   jax.ShapeDtypeStruct((n_p, cout_p), jnp.bfloat16)),
        grid=(gm,),
        in_specs=[
            pl.BlockSpec((tm, cin_p), lambda i: (i, 0)),         # x rows
            pl.BlockSpec((cin_p, h_p), lambda i: (0, 0)),        # W1
            pl.BlockSpec((cin_p, h_p), lambda i: (0, 0)),        # Wf1
            pl.BlockSpec((1, h_p), lambda i: (0, 0)),            # bf1
            pl.BlockSpec((h_p, cout_p), lambda i: (0, 0)),       # Wf2
            pl.BlockSpec((1, cout_p), lambda i: (0, 0)),         # bf2
        ],
        out_specs=(
            pl.BlockSpec((tm, h_p), lambda i: (i, 0)),
            pl.BlockSpec((tm, h_p), lambda i: (i, 0)),
            pl.BlockSpec((tm, cout_p), lambda i: (i, 0)),
        ),
        compiler_params=cparams_rows,
    )(x_b, w1_b, wf1_b, bf1_p, wf2_b, bf2_p)

    # Index maps: scalar-prefetch refs (blk, cnt) are passed positionally.
    adj_map = lambda i, k, blk_ref, cnt_ref: (i, blk_ref[i, k])
    col_map = lambda i, k, blk_ref, cnt_ref: (blk_ref[i, k], 0)
    row_map = lambda i, k, blk_ref, cnt_ref: (i, 0)
    const_map = lambda i, k, blk_ref, cnt_ref: (0, 0)
    # NOTE: pipeline_mode=pl.Buffered(3) on the adj spec is an optional knob if
    # profiling shows exposed DMA with large tiles.

    # ---- Pass B: layer-1 aggregation over nonzero adjacency blocks ----
    mw2 = pl.pallas_call(
        agg1_kernel,
        out_shape=jax.ShapeDtypeStruct((n_p, cout_p), jnp.bfloat16),
        grid_spec=pltpu.PrefetchScalarGridSpec(
            num_scalar_prefetch=2,
            grid=(gm, max_nnz),
            in_specs=[
                pl.BlockSpec(memory_space=pltpu.MemorySpace.SMEM),  # betas
                pl.BlockSpec((tm, tk), adj_map),                    # A_hat block
                pl.BlockSpec((tk, h_p), col_map),                   # xw1 rows
                pl.BlockSpec((tm, h_p), row_map),                   # hfc rows
                pl.BlockSpec((1, h_p), const_map),                  # b1
                pl.BlockSpec((h_p, cout_p), const_map),             # W2
            ],
            out_specs=pl.BlockSpec((tm, cout_p), row_map),
            scratch_shapes=[pltpu.VMEM((tm, h_p), jnp.float32)]),
        compiler_params=cparams_agg,
        cost_estimate=pl.CostEstimate(
            flops=int(2 * nnz_blocks * tm * tk * h_p + 2 * n_p * h_p * cout_p),
            transcendentals=0,
            bytes_accessed=int(2 * nnz_blocks * tm * tk + 3 * 2 * n_p * h_p
                               + 2 * n_p * cout_p)),
    )(blk, cnt, betas, adj_b, xw1, hfc, b1_p, w2_b)

    # ---- Pass C: layer-2 aggregation + masked log_softmax ----
    out_full = pl.pallas_call(
        functools.partial(agg2_kernel, cout=cout),
        out_shape=jax.ShapeDtypeStruct((n_p, cout_p), jnp.float32),
        grid_spec=pltpu.PrefetchScalarGridSpec(
            num_scalar_prefetch=2,
            grid=(gm, max_nnz),
            in_specs=[
                pl.BlockSpec(memory_space=pltpu.MemorySpace.SMEM),  # betas
                pl.BlockSpec((tm, tk), adj_map),                    # A_hat block
                pl.BlockSpec((tk, cout_p), col_map),                # mw2 rows
                pl.BlockSpec((tm, cout_p), row_map),                # ofc rows
                pl.BlockSpec((1, cout_p), const_map),               # b2
            ],
            out_specs=pl.BlockSpec((tm, cout_p), row_map),
            scratch_shapes=[pltpu.VMEM((tm, cout_p), jnp.float32)]),
        compiler_params=cparams_agg,
        cost_estimate=pl.CostEstimate(
            flops=int(2 * nnz_blocks * tm * tk * cout_p),
            transcendentals=int(n_p * cout_p),
            bytes_accessed=int(2 * nnz_blocks * tm * tk + 2 * 2 * n_p * cout_p
                               + 4 * n_p * cout_p)),
    )(blk, cnt, betas, adj_b, mw2, ofc, b2_p)

    return out_full[:n, :cout]


def init_params(key, in_channels, hidden_channels, out_channels):
    ks = jax.random.split(key, 8)
    s1 = 1.0 / jnp.sqrt(in_channels)
    s2 = 1.0 / jnp.sqrt(hidden_channels)
    return {
        # GCNConv1 / GCNConv2 weights (applied as x @ W) and biases
        "w1":  jax.random.uniform(ks[0], (in_channels, hidden_channels), jnp.float32, -s1, s1),
        "b1":  jnp.zeros((1, hidden_channels), jnp.float32),
        "w2":  jax.random.uniform(ks[1], (hidden_channels, out_channels), jnp.float32, -s2, s2),
        "b2":  jnp.zeros((1, out_channels), jnp.float32),
        # fc1 / fc2 (nn.Linear: y = x @ W^T + b; stored already transposed)
        "wf1": jax.random.uniform(ks[2], (in_channels, hidden_channels), jnp.float32, -s1, s1),
        "bf1": jax.random.uniform(ks[3], (1, hidden_channels), jnp.float32, -s1, s1),
        "wf2": jax.random.uniform(ks[4], (hidden_channels, out_channels), jnp.float32, -s2, s2),
        "bf2": jax.random.uniform(ks[5], (1, out_channels), jnp.float32, -s2, s2),
        "beta1": jnp.float32(0.5),
        "beta2": jnp.float32(0.5),
    }


def _ring_edges(num_nodes):
    idx = jnp.arange(num_nodes)
    nxt = (idx + 1) % num_nodes
    src = jnp.concatenate([idx, nxt])
    dst = jnp.concatenate([nxt, idx])
    return jnp.stack([src, dst], axis=0).astype(jnp.int32)


def _reference_forward(x, edge_index, params):
    adj = build_normalized_adj(edge_index, x.shape[0])
    h_gcn = jnp.maximum(adj @ (x @ params["w1"]) + params["b1"], 0.0)
    h_fc = jnp.maximum(x @ params["wf1"] + params["bf1"], 0.0)
    mix = params["beta1"] * h_gcn + (1.0 - params["beta1"]) * h_fc
    z = (params["beta2"] * (adj @ (mix @ params["w2"]) + params["b2"])
         + (1.0 - params["beta2"]) * (h_fc @ params["wf2"] + params["bf2"]))
    return jax.nn.log_softmax(z, axis=1)


if __name__ == "__main__":
    key = jax.random.PRNGKey(0)
    k_x, k_p, k_x2 = jax.random.split(key, 3)

    in_channels, hidden_channels, out_channels = 4, 32, 8
    params = init_params(k_p, in_channels, hidden_channels, out_channels)

    # ---- test 1: small graph -> fused single-kernel path ----
    num_nodes = 16
    x = jax.random.normal(k_x, (num_nodes, in_channels), dtype=jnp.float32)
    edge_index = _ring_edges(num_nodes)

    out = jax.block_until_ready(interlayer_forward(x, edge_index, params))
    assert out.shape == (num_nodes, out_channels)
    # rows of log_softmax should exponentiate-sum to ~1
    assert bool(jnp.all(jnp.abs(jnp.sum(jnp.exp(out), axis=1) - 1.0) < 1e-3))
    ref = _reference_forward(x, edge_index, params)
    assert bool(jnp.max(jnp.abs(out - ref)) < 0.1)   # bf16 MXU -> loose tolerance

    # ---- test 2: larger graph -> streamed block-sparse path (forced) ----
    num_nodes2 = 500
    x2 = jax.random.normal(k_x2, (num_nodes2, in_channels), dtype=jnp.float32)
    edge_index2 = _ring_edges(num_nodes2)
    out2 = jax.block_until_ready(
        interlayer_forward(x2, edge_index2, params,
                           max_tile=128, fused_max_nodes=0))
    assert out2.shape == (num_nodes2, out_channels)
    assert bool(jnp.all(jnp.abs(jnp.sum(jnp.exp(out2), axis=1) - 1.0) < 1e-3))
    ref2 = _reference_forward(x2, edge_index2, params)
    assert bool(jnp.max(jnp.abs(out2 - ref2)) < 0.1)

    print("KERNEL_OK")
</pallas_src>

<mosaic_0001>
module attributes {stable_mosaic.version = 11 : i64} {
  func.func @fused_kernel(%arg0: i32, %arg1: memref<2xf32, #tpu.memory_space<smem>>, %arg2: memref<128x128xbf16, #tpu.memory_space<vmem>>, %arg3: memref<128x128xbf16, #tpu.memory_space<vmem>>, %arg4: memref<128x128xbf16, #tpu.memory_space<vmem>>, %arg5: memref<1x128xf32, #tpu.memory_space<vmem>>, %arg6: memref<128x128xbf16, #tpu.memory_space<vmem>>, %arg7: memref<1x128xf32, #tpu.memory_space<vmem>>, %arg8: memref<128x128xbf16, #tpu.memory_space<vmem>>, %arg9: memref<1x128xf32, #tpu.memory_space<vmem>>, %arg10: memref<128x128xbf16, #tpu.memory_space<vmem>>, %arg11: memref<1x128xf32, #tpu.memory_space<vmem>>, %arg12: memref<128x128xf32, #tpu.memory_space<vmem>>) attributes {dimension_semantics = [#tpu.dimension_semantics<arbitrary>], iteration_bounds = array<i64: 1>, scalar_prefetch = 0 : i64, scratch_operands = 0 : i64, tpu.core_type = #tpu.core_type<tc>, window_params = [{transform_indices = @transform_0, window_bounds = array<i64: 2>}, {pipeline_mode = #tpu.pipeline_mode<synchronous>, transform_indices = @transform_1, window_bounds = array<i64: 128, 128>}, {pipeline_mode = #tpu.pipeline_mode<synchronous>, transform_indices = @transform_2, window_bounds = array<i64: 128, 128>}, {pipeline_mode = #tpu.pipeline_mode<synchronous>, transform_indices = @transform_3, window_bounds = array<i64: 128, 128>}, {pipeline_mode = #tpu.pipeline_mode<synchronous>, transform_indices = @transform_4, window_bounds = array<i64: 1, 128>}, {pipeline_mode = #tpu.pipeline_mode<synchronous>, transform_indices = @transform_5, window_bounds = array<i64: 128, 128>}, {pipeline_mode = #tpu.pipeline_mode<synchronous>, transform_indices = @transform_6, window_bounds = array<i64: 1, 128>}, {pipeline_mode = #tpu.pipeline_mode<synchronous>, transform_indices = @transform_7, window_bounds = array<i64: 128, 128>}, {pipeline_mode = #tpu.pipeline_mode<synchronous>, transform_indices = @transform_8, window_bounds = array<i64: 1, 128>}, {pipeline_mode = #tpu.pipeline_mode<synchronous>, transform_indices = @transform_9, window_bounds = array<i64: 128, 128>}, {pipeline_mode = #tpu.pipeline_mode<synchronous>, transform_indices = @transform_10, window_bounds = array<i64: 1, 128>}, {pipeline_mode = #tpu.pipeline_mode<synchronous>, transform_indices = @transform_11, window_bounds = array<i64: 128, 128>}]} {
    %c0 = arith.constant 0 : index
    %0 = memref.load %arg1[%c0] : memref<2xf32, #tpu.memory_space<smem>>
    %c1 = arith.constant 1 : index
    %1 = memref.load %arg1[%c1] : memref<2xf32, #tpu.memory_space<smem>>
    %c0_0 = arith.constant 0 : index
    %c0_1 = arith.constant 0 : index
    %2 = vector.load %arg3[%c0_0, %c0_1] : memref<128x128xbf16, #tpu.memory_space<vmem>>, vector<128x128xbf16>
    %c0_2 = arith.constant 0 : index
    %c0_3 = arith.constant 0 : index
    %3 = vector.load %arg2[%c0_2, %c0_3] : memref<128x128xbf16, #tpu.memory_space<vmem>>, vector<128x128xbf16>
    %c0_4 = arith.constant 0 : index
    %c0_5 = arith.constant 0 : index
    %4 = vector.load %arg4[%c0_4, %c0_5] : memref<128x128xbf16, #tpu.memory_space<vmem>>, vector<128x128xbf16>
    %cst = arith.constant dense<0.000000e+00> : vector<128x128xf32>
    %5 = tpu.matmul %2, %4, %cst {dimension_numbers = #tpu.dot_dimension_numbers<[1], [0], [0], [1], [0, 0, 1, 1], [], []>} : vector<128x128xbf16>, vector<128x128xbf16>, vector<128x128xf32> -> vector<128x128xf32>
    %6 = arith.truncf %5 : vector<128x128xf32> to vector<128x128xbf16>
    %c0_6 = arith.constant 0 : index
    %c0_7 = arith.constant 0 : index
    %7 = vector.load %arg6[%c0_6, %c0_7] : memref<128x128xbf16, #tpu.memory_space<vmem>>, vector<128x128xbf16>
    %cst_8 = arith.constant dense<0.000000e+00> : vector<128x128xf32>
    %8 = tpu.matmul %2, %7, %cst_8 {dimension_numbers = #tpu.dot_dimension_numbers<[1], [0], [0], [1], [0, 0, 1, 1], [], []>} : vector<128x128xbf16>, vector<128x128xbf16>, vector<128x128xf32> -> vector<128x128xf32>
    %c0_9 = arith.constant 0 : index
    %c0_10 = arith.constant 0 : index
    %9 = vector.load %arg7[%c0_9, %c0_10] : memref<1x128xf32, #tpu.memory_space<vmem>>, vector<1x128xf32>
    %10 = vector.broadcast %9 : vector<1x128xf32> to vector<128x128xf32>
    %11 = arith.addf %8, %10 : vector<128x128xf32>
    %cst_11 = arith.constant 0.000000e+00 : f32
    %12 = vector.broadcast %cst_11 : f32 to vector<128x128xf32>
    %13 = arith.maximumf %11, %12 : vector<128x128xf32>
    %cst_12 = arith.constant dense<0.000000e+00> : vector<128x128xf32>
    %14 = tpu.matmul %3, %6, %cst_12 {dimension_numbers = #tpu.dot_dimension_numbers<[1], [0], [0], [1], [0, 0, 1, 1], [], []>} : vector<128x128xbf16>, vector<128x128xbf16>, vector<128x128xf32> -> vector<128x128xf32>
    %c0_13 = arith.constant 0 : index
    %c0_14 = arith.constant 0 : index
    %15 = vector.load %arg5[%c0_13, %c0_14] : memref<1x128xf32, #tpu.memory_space<vmem>>, vector<1x128xf32>
    %16 = vector.broadcast %15 : vector<1x128xf32> to vector<128x128xf32>
    %17 = arith.addf %14, %16 : vector<128x128xf32>
    %cst_15 = arith.constant 0.000000e+00 : f32
    %18 = vector.broadcast %cst_15 : f32 to vector<128x128xf32>
    %19 = arith.maximumf %17, %18 : vector<128x128xf32>
    %20 = vector.broadcast %0 : f32 to vector<128x128xf32>
    %21 = arith.mulf %20, %19 : vector<128x128xf32>
    %cst_16 = arith.constant 1.000000e+00 : f32
    %22 = arith.subf %cst_16, %0 : f32
    %23 = vector.broadcast %22 : f32 to vector<128x128xf32>
    %24 = arith.mulf %23, %13 : vector<128x128xf32>
    %25 = arith.addf %21, %24 : vector<128x128xf32>
    %26 = arith.truncf %25 : vector<128x128xf32> to vector<128x128xbf16>
    %c0_17 = arith.constant 0 : index
    %c0_18 = arith.constant 0 : index
    %27 = vector.load %arg8[%c0_17, %c0_18] : memref<128x128xbf16, #tpu.memory_space<vmem>>, vector<128x128xbf16>
    %cst_19 = arith.constant dense<0.000000e+00> : vector<128x128xf32>
    %28 = tpu.matmul %26, %27, %cst_19 {dimension_numbers = #tpu.dot_dimension_numbers<[1], [0], [0], [1], [0, 0, 1, 1], [], []>} : vector<128x128xbf16>, vector<128x128xbf16>, vector<128x128xf32> -> vector<128x128xf32>
    %29 = arith.truncf %28 : vector<128x128xf32> to vector<128x128xbf16>
    %30 = arith.truncf %13 : vector<128x128xf32> to vector<128x128xbf16>
    %c0_20 = arith.constant 0 : index
    %c0_21 = arith.constant 0 : index
    %31 = vector.load %arg10[%c0_20, %c0_21] : memref<128x128xbf16, #tpu.memory_space<vmem>>, vector<128x128xbf16>
    %cst_22 = arith.constant dense<0.000000e+00> : vector<128x128xf32>
    %32 = tpu.matmul %30, %31, %cst_22 {dimension_numbers = #tpu.dot_dimension_numbers<[1], [0], [0], [1], [0, 0, 1, 1], [], []>} : vector<128x128xbf16>, vector<128x128xbf16>, vector<128x128xf32> -> vector<128x128xf32>
    %c0_23 = arith.constant 0 : index
    %c0_24 = arith.constant 0 : index
    %33 = vector.load %arg11[%c0_23, %c0_24] : memref<1x128xf32, #tpu.memory_space<vmem>>, vector<1x128xf32>
    %34 = vector.broadcast %33 : vector<1x128xf32> to vector<128x128xf32>
    %35 = arith.addf %32, %34 : vector<128x128xf32>
    %cst_25 = arith.constant dense<0.000000e+00> : vector<128x128xf32>
    %36 = tpu.matmul %3, %29, %cst_25 {dimension_numbers = #tpu.dot_dimension_numbers<[1], [0], [0], [1], [0, 0, 1, 1], [], []>} : vector<128x128xbf16>, vector<128x128xbf16>, vector<128x128xf32> -> vector<128x128xf32>
    %c0_26 = arith.constant 0 : index
    %c0_27 = arith.constant 0 : index
    %37 = vector.load %arg9[%c0_26, %c0_27] : memref<1x128xf32, #tpu.memory_space<vmem>>, vector<1x128xf32>
    %38 = vector.broadcast %37 : vector<1x128xf32> to vector<128x128xf32>
    %39 = arith.addf %36, %38 : vector<128x128xf32>
    %40 = vector.broadcast %1 : f32 to vector<128x128xf32>
    %41 = arith.mulf %40, %39 : vector<128x128xf32>
    %cst_28 = arith.constant 1.000000e+00 : f32
    %42 = arith.subf %cst_28, %1 : f32
    %43 = vector.broadcast %42 : f32 to vector<128x128xf32>
    %44 = arith.mulf %43, %35 : vector<128x128xf32>
    %45 = arith.addf %41, %44 : vector<128x128xf32>
    %46 = tpu.iota {dimensions = array<i32: 1>} : vector<128x128xi32>
    %c8_i32 = arith.constant 8 : i32
    %47 = vector.broadcast %c8_i32 : i32 to vector<128x128xi32>
    %48 = arith.cmpi slt, %46, %47 : vector<128x128xi32>
    %cst_29 = arith.constant 0xFF800000 : f32
    %49 = vector.broadcast %cst_29 : f32 to vector<128x128xf32>
    %50 = arith.select %48, %45, %49 : vector<128x128xi1>, vector<128x128xf32>
    %cst_30 = arith.constant dense<0xFF800000> : vector<128xf32>
    %51 = vector.multi_reduction <maximumf>, %50, %cst_30 [1] : vector<128x128xf32> to vector<128xf32>
    %52 = vector.shape_cast %51 : vector<128xf32> to vector<128x1xf32>
    %53 = vector.broadcast %52 : vector<128x1xf32> to vector<128x128xf32>
    %54 = arith.subf %45, %53 : vector<128x128xf32>
    %55 = math.exp %54 : vector<128x128xf32>
    %cst_31 = arith.constant 0.000000e+00 : f32
    %56 = vector.broadcast %cst_31 : f32 to vector<128x128xf32>
    %57 = arith.select %48, %55, %56 : vector<128x128xi1>, vector<128x128xf32>
    %cst_32 = arith.constant dense<0.000000e+00> : vector<128xf32>
    %58 = vector.multi_reduction <add>, %57, %cst_32 [1] : vector<128x128xf32> to vector<128xf32>
    %59 = vector.shape_cast %58 : vector<128xf32> to vector<128x1xf32>
    %60 = math.log %59 : vector<128x1xf32>
    %61 = vector.broadcast %52 : vector<128x1xf32> to vector<128x128xf32>
    %62 = arith.subf %45, %61 : vector<128x128xf32>
    %63 = vector.broadcast %60 : vector<128x1xf32> to vector<128x128xf32>
    %64 = arith.subf %62, %63 : vector<128x128xf32>
    %cst_33 = arith.constant 0.000000e+00 : f32
    %65 = vector.broadcast %cst_33 : f32 to vector<128x128xf32>
    %66 = arith.select %48, %64, %65 : vector<128x128xi1>, vector<128x128xf32>
    %c0_34 = arith.constant 0 : index
    %c0_35 = arith.constant 0 : index
    %67 = vector.load %arg12[%c0_34, %c0_35] : memref<128x128xf32, #tpu.memory_space<vmem>>, vector<128x128xf32>
    tpu.vector_store %arg12[%c0_34, %c0_35], %66 {strides = array<i32>} : memref<128x128xf32, #tpu.memory_space<vmem>>, vector<128x128xf32>,
    return
  }
  func.func @transform_0(%arg0: i32) -> i32 {
    %c0_i32 = arith.constant 0 : i32
    %c0_i32_0 = arith.constant 0 : i32
    return %c0_i32 : i32
  }
  func.func @transform_1(%arg0: i32) -> (i32, i32) {
    %c0_i32 = arith.constant 0 : i32
    %c0_i32_0 = arith.constant 0 : i32
    %c0_i32_1 = arith.constant 0 : i32
    return %c0_i32, %c0_i32_0 : i32, i32
  }
  func.func @transform_2(%arg0: i32) -> (i32, i32) {
    %c0_i32 = arith.constant 0 : i32
    %c0_i32_0 = arith.constant 0 : i32
    %c0_i32_1 = arith.constant 0 : i32
    return %c0_i32, %c0_i32_0 : i32, i32
  }
  func.func @transform_3(%arg0: i32) -> (i32, i32) {
    %c0_i32 = arith.constant 0 : i32
    %c0_i32_0 = arith.constant 0 : i32
    %c0_i32_1 = arith.constant 0 : i32
    return %c0_i32, %c0_i32_0 : i32, i32
  }
  func.func @transform_4(%arg0: i32) -> (i32, i32) {
    %c0_i32 = arith.constant 0 : i32
    %c0_i32_0 = arith.constant 0 : i32
    %c0_i32_1 = arith.constant 0 : i32
    return %c0_i32, %c0_i32_0 : i32, i32
  }
  func.func @transform_5(%arg0: i32) -> (i32, i32) {
    %c0_i32 = arith.constant 0 : i32
    %c0_i32_0 = arith.constant 0 : i32
    %c0_i32_1 = arith.constant 0 : i32
    return %c0_i32, %c0_i32_0 : i32, i32
  }
  func.func @transform_6(%arg0: i32) -> (i32, i32) {
    %c0_i32 = arith.constant 0 : i32
    %c0_i32_0 = arith.constant 0 : i32
    %c0_i32_1 = arith.constant 0 : i32
    return %c0_i32, %c0_i32_0 : i32, i32
  }
  func.func @transform_7(%arg0: i32) -> (i32, i32) {
    %c0_i32 = arith.constant 0 : i32
    %c0_i32_0 = arith.constant 0 : i32
    %c0_i32_1 = arith.constant 0 : i32
    return %c0_i32, %c0_i32_0 : i32, i32
  }
  func.func @transform_8(%arg0: i32) -> (i32, i32) {
    %c0_i32 = arith.constant 0 : i32
    %c0_i32_0 = arith.constant 0 : i32
    %c0_i32_1 = arith.constant 0 : i32
    return %c0_i32, %c0_i32_0 : i32, i32
  }
  func.func @transform_9(%arg0: i32) -> (i32, i32) {
    %c0_i32 = arith.constant 0 : i32
    %c0_i32_0 = arith.constant 0 : i32
    %c0_i32_1 = arith.constant 0 : i32
    return %c0_i32, %c0_i32_0 : i32, i32
  }
  func.func @transform_10(%arg0: i32) -> (i32, i32) {
    %c0_i32 = arith.constant 0 : i32
    %c0_i32_0 = arith.constant 0 : i32
    %c0_i32_1 = arith.constant 0 : i32
    return %c0_i32, %c0_i32_0 : i32, i32
  }
  func.func @transform_11(%arg0: i32) -> (i32, i32) {
    %c0_i32 = arith.constant 0 : i32
    %c0_i32_0 = arith.constant 0 : i32
    %c0_i32_1 = arith.constant 0 : i32
    return %c0_i32, %c0_i32_0 : i32, i32
  }
}

</mosaic_0001>

<bundles_post_ra>
// kernel: tpu_custom_call.1
= control target key start
LH: loop header
LB: loop body
LE: loop exit
PB: predicated region body
PF: predicated region fallthrough
CT: control target
= control target key end

     0   :  { %16 = vsyncpa [#allocation5], 0  ;;  %s2812_s0 = inlined_call_operand.hbm [shape: f32[2], index: 0, kind: input, shape index: {}]   ;;  %s2813_s1 = inlined_call_operand.hbm [shape: bf16[128,128], index: 1, kind: input, shape index: {}]   ;;  %s2814_s2 = inlined_call_operand.hbm [shape: bf16[128,128], index: 2, kind: input, shape index: {}]   ;;  %s2815_s3 = inlined_call_operand.hbm [shape: bf16[128,128], index: 3, kind: input, shape index: {}]   ;;  %s2816_s4 = inlined_call_operand.vmem [shape: f32[1,128], index: 4, kind: input, shape index: {}]   ;;  %s2817_s5 = inlined_call_operand.hbm [shape: bf16[128,128], index: 5, kind: input, shape index: {}]   ;;  %s2818_s6 = inlined_call_operand.vmem [shape: f32[1,128], index: 6, kind: input, shape index: {}]   ;;  %s2819_s7 = inlined_call_operand.hbm [shape: bf16[128,128], index: 7, kind: input, shape index: {}]   ;;  %s2820_s8 = inlined_call_operand.vmem [shape: f32[1,128], index: 8, kind: input, shape index: {}]   ;;  %s2821_s9 = inlined_call_operand.hbm [shape: bf16[128,128], index: 9, kind: input, shape index: {}]   ;;  %s2822_s10 = inlined_call_operand.vmem [shape: f32[1,128], index: 10, kind: input, shape index: {}]   ;;  %s2823_s11 = inlined_call_operand.hbm [shape: f32[128,128], index: 11, kind: output, shape index: {}]  }
   0x1   :  { %17 = vsyncpa [#allocation3], 0 }
   0x2   :  { %18 = vsyncpa [#allocation8], 0 }
   0x3   :  { %19 = vsyncpa [#allocation11], 0 }
   0x4   :  { %20 = vsyncpa [#allocation14], 0 }
   0x5   :  { %21 = vsyncpa [#allocation4], 0  ;;  %s2168_s17 = smov [#allocation7]   ;;  %s2169_s19 = smov [#allocation10]  }
   0x6   :  { %s47_s18 = sshll.u32 %s2168_s17, 4  ;;  %s73_s20 = sshll.u32 %s2169_s19, 4  ;;  %s48_s18 = int_to_ptr.vmem [resolvable:$true] %s47_s18  ;;  %s74_s20 = int_to_ptr.vmem [resolvable:$true] %s73_s20 }
   0x7   :  { %s2016_s21 = scalar_lea.vmem %s48_s18, 1024  ;;  %p2021_p1 = scmp.lt.s32.totalorder %s48_s18, %s48_s18 }
   0x8   :  { %p2017_p0 = scmp.ne.s32.totalorder %s48_s18, %s2016_s21  ;;  %p2022_p2 = scmp.lt.s32.totalorder %s2016_s21, %s2016_s21 }
   0xa   :  { %p2023_p3 = por %p2022_p2, %p2021_p1 }
   0xc   :  { %p2024_p4 = pnand %p2023_p3, %p2017_p0 }
   0xe   :  { %2027 = shalt.err (!%p2024_p4)
}
   0xf   :  { %s2170_s22 = smov 64   ;;  %s2171_s23 = smov 4  }
  0x10   :  { %53 = dma.hbm_to_vmem [thread:$0]  %s2814_s2, 1024, %s48_s18, [#allocation8], %s2170_s22, %s2170_s22, %s2171_s23  }
  0x11   :  { %s2036_s26 = scalar_lea.vmem %s74_s20, 1024  ;;  %p2041_p6 = scmp.lt.s32.totalorder %s74_s20, %s74_s20 }
  0x12   :  { %p2037_p5 = scmp.ne.s32.totalorder %s74_s20, %s2036_s26  ;;  %p2042_p7 = scmp.lt.s32.totalorder %s2036_s26, %s2036_s26 }
  0x14   :  { %p2043_p8 = por %p2042_p7, %p2041_p6 }
  0x16   :  { %p2044_p9 = pnand %p2043_p8, %p2037_p5 }
  0x18   :  { %2047 = shalt.err (!%p2044_p9)
}
  0x19   :  { %79 = dma.hbm_to_vmem [thread:$0]  %s2817_s5, 1024, %s74_s20, [#allocation11], %s2170_s22, %s2170_s22, %s2171_s23  }
  0x1a   :  { %s2172_s29 = smov [#allocation2]   ;;  %s2173_s2 = smov [#allocation6]  }
  0x1b   :  { %29 = dma.hbm_to_smem %s2812_s0, 16, %s2172_s29, [#allocation5]  }
  0x1c   :  { %s35_s13 = sshll.u32 %s2173_s2, 4  ;;  %s2174_s14 = smov [#allocation9]   ;;  %s36_s13 = int_to_ptr.vmem [resolvable:$true] %s35_s13 }
  0x1d   :  { %s59_s15 = sshll.u32 %s2174_s14, 4  ;;  %s2064_s16 = scalar_lea.vmem %s36_s13, 1024  ;;  %s60_s15 = int_to_ptr.vmem [resolvable:$true] %s59_s15 }
  0x1e   :  { %p2065_p10 = scmp.ne.s32.totalorder %s36_s13, %s2064_s16  ;;  %p2069_p11 = scmp.lt.s32.totalorder %s36_s13, %s36_s13 }
  0x1f   :  { %p2070_p12 = scmp.lt.s32.totalorder %s2064_s16, %s2064_s16 }
  0x21   :  { %p2071_p13 = por %p2070_p12, %p2069_p11 }
  0x23   :  { %p2072_p0 = pnand %p2071_p13, %p2065_p10 }
  0x25   :  { %2075 = shalt.err (!%p2072_p0)
}
  0x26   :  { %41 = dma.hbm_to_vmem [thread:$0]  %s2813_s1, 1024, %s36_s13, [#allocation3], %s2170_s22, %s2170_s22, %s2171_s23  }
  0x27   :  { %s2084_s0 = scalar_lea.vmem %s60_s15, 1024  ;;  %p2089_p2 = scmp.lt.s32.totalorder %s60_s15, %s60_s15 }
  0x28   :  { %p2085_p1 = scmp.ne.s32.totalorder %s60_s15, %s2084_s0  ;;  %p2090_p3 = scmp.lt.s32.totalorder %s2084_s0, %s2084_s0 }
  0x2a   :  { %p2091_p4 = por %p2090_p3, %p2089_p2 }
  0x2c   :  { %p2092_p5 = pnand %p2091_p4, %p2085_p1 }
  0x2e   :  { %2095 = shalt.err (!%p2092_p5)
}
  0x2f   :  { %65 = dma.hbm_to_vmem [thread:$0]  %s2815_s3, 1024, %s60_s15, [#allocation8], %s2170_s22, %s2170_s22, %s2171_s23  }
  0x30   :  { %s2175_s20 = smov [#allocation12]   ;;  %s2176_s24 = smov [#allocation13]  }
  0x31   :  { %s87_s21 = sshll.u32 %s2175_s20, 4  ;;  %s101_s1 = sshll.u32 %s2176_s24, 4  ;;  %s88_s21 = int_to_ptr.vmem [resolvable:$true] %s87_s21  ;;  %s102_s1 = int_to_ptr.vmem [resolvable:$true] %s101_s1 }
  0x32   :  { %s2104_s25 = scalar_lea.vmem %s88_s21, 1024  ;;  %p2109_p7 = scmp.lt.s32.totalorder %s88_s21, %s88_s21 }
  0x33   :  { %p2105_p6 = scmp.ne.s32.totalorder %s88_s21, %s2104_s25  ;;  %p2110_p8 = scmp.lt.s32.totalorder %s2104_s25, %s2104_s25 }
  0x35   :  { %p2111_p9 = por %p2110_p8, %p2109_p7 }
  0x37   :  { %p2112_p10 = pnand %p2111_p9, %p2105_p6 }
  0x39   :  { %2115 = shalt.err (!%p2112_p10)
}
  0x3a   :  { %93 = dma.hbm_to_vmem [thread:$0]  %s2819_s7, 1024, %s88_s21, [#allocation11], %s2170_s22, %s2170_s22, %s2171_s23  }
  0x3b   :  { %s2124_s3 = scalar_lea.vmem %s102_s1, 1024  ;;  %p2129_p12 = scmp.lt.s32.totalorder %s102_s1, %s102_s1 }
  0x3c   :  { %p2125_p11 = scmp.ne.s32.totalorder %s102_s1, %s2124_s3  ;;  %p2130_p13 = scmp.lt.s32.totalorder %s2124_s3, %s2124_s3 }
  0x3e   :  { %p2131_p0 = por %p2130_p13, %p2129_p12 }
  0x40   :  { %p2132_p1 = pnand %p2131_p0, %p2125_p11 }
  0x42   :  { %2135 = shalt.err (!%p2132_p1)
}
  0x43   :  { %107 = dma.hbm_to_vmem [thread:$0]  %s2821_s9, 1024, %s102_s1, [#allocation14], %s2170_s22, %s2170_s22, %s2171_s23  }
  0x44   :  { %2156 = dma.done.wait [#allocation5], 16  }
  0x45   :  { %2157 = vsyncadd [#allocation5], 4294967280 }
  0x46   :  { %2158 = dma.done.wait [#allocation3], 1024  }
  0x47   :  { %2159 = vsyncadd [#allocation3], 4294966272 }
  0x48   :  { %2160 = dma.done.wait [#allocation8], 2048  }
  0x49   :  { %2161 = vsyncadd [#allocation8], 4294965248 }
  0x4a   :  { %2162 = dma.done.wait [#allocation11], 2048  }
  0x4b   :  { %2163 = vsyncadd [#allocation11], 4294965248 }
  0x4c   :  { %2164 = dma.done.wait [#allocation14], 1024  }
  0x4d   :  { %2165 = vsyncadd [#allocation14], 4294966272 }
  0x4e   :  { %131 = sfence }
  0x4f   :  { %v1896_v0 = vld [vmem:[#allocation9 + $0x38] sm:$0xff]   ;;  %v1897_v1 = vld [vmem:[#allocation9 + $0x30] sm:$0xff]   ;;  %v1898_v2 = vld [vmem:[#allocation9 + $0x28] sm:$0xff]  }
  0x50   :  { %1692 = vmatprep.subr.bf16.mxu0 %v1896_v0  ;;  %v1899_v3 = vld [vmem:[#allocation9 + $0x20] sm:$0xff]   ;;  %v1900_v5 = vld [vmem:[#allocation9 + $0x18] sm:$0xff]   ;;  %v1901_v6 = vld [vmem:[#allocation9 + $0x10] sm:$0xff]  }
  0x51   :  { %1693 = vmatpush3.bf16.msra.mxu0 %v1896_v0  ;;  %v1904_v4 = vld [vmem:[#allocation7] sm:$0xff]   ;;  %v1902_v7 = vld [vmem:[#allocation9 + $0x8] sm:$0xff]   ;;  %v1906_v10 = vld [vmem:[#allocation7 + $0x10] sm:$0xff]  }
  0x52   :  { %1694 = vmatprep.subr.bf16.mxu0 %v1897_v1  ;;  %1708 = vmatprep.mubr.bf16.mxu0 %v1904_v4  ;;  %v1903_v8 = vld [vmem:[#allocation9] sm:$0xff]   ;;  %v1905_v9 = vld [vmem:[#allocation7 + $0x8] sm:$0xff]   ;;  %v1907_v11 = vld [vmem:[#allocation7 + $0x18] sm:$0xff]  }
  0x53   :  { %1740 = vmatprep.mubr.bf16.mxu1 %v1904_v4  ;;  %v1908_v12 = vld [vmem:[#allocation7 + $0x20] sm:$0xff]   ;;  %v1909_v13 = vld [vmem:[#allocation7 + $0x28] sm:$0xff]   ;;  %v1910_v14 = vld [vmem:[#allocation7 + $0x30] sm:$0xff]  }
  0x54   :  { %v1911_v15 = vld [vmem:[#allocation7 + $0x38] sm:$0xff]   ;;  %v1913_v17 = vld [vmem:[#allocation10 + $0x30] sm:$0xff]   ;;  %v1914_v18 = vld [vmem:[#allocation10 + $0x28] sm:$0xff]  }
  0x55   :  { %1695 = vmatpush3.bf16.msra.mxu0 %v1897_v1  ;;  %v1912_v16 = vld [vmem:[#allocation10 + $0x38] sm:$0xff]   ;;  %v1915_v19 = vld [vmem:[#allocation10 + $0x20] sm:$0xff]   ;;  %v1917_v21 = vld [vmem:[#allocation10 + $0x10] sm:$0xff]  }
  0x56   :  { %1696 = vmatprep.subr.bf16.mxu0 %v1898_v2  ;;  %1724 = vmatprep.subr.bf16.mxu1 %v1912_v16  ;;  %v1916_v20 = vld [vmem:[#allocation10 + $0x18] sm:$0xff]   ;;  %v1918_v22 = vld [vmem:[#allocation10 + $0x8] sm:$0xff]   ;;  %v1919_v23 = vld [vmem:[#allocation10] sm:$0xff]  }
  0x57   :  { %1725 = vmatpush3.bf16.msra.mxu1 %v1912_v16  ;;  %v2279_v24 = vld [vmem:[#allocation6] sm:$0xff]   ;;  %v1933_v25 = vld [vmem:[#allocation12 + $0x38] sm:$0xff]   ;;  %v1935_v26 = vld [vmem:[#allocation12 + $0x30] sm:$0xff]  }
  0x58   :  { %1726 = vmatprep.subr.bf16.mxu1 %v1913_v17  ;;  %v1937_v27 = vld [vmem:[#allocation12 + $0x28] sm:$0xff]   ;;  %v1939_v29 = vld [vmem:[#allocation12 + $0x20] sm:$0xff]   ;;  %v1928_v53 = vld [vmem:[#allocation13 + $0x38] sm:$0xff]  }
  0x59   :  { %1697 = vmatpush3.bf16.msra.mxu0 %v1898_v2  ;;  %v2282_v54 = vld [vmem:[#allocation6 + $0x8] sm:$0xff]   ;;  %v2284_v55 = vld [vmem:[#allocation6 + $0x10] sm:$0xff]   ;;  %v2288_v58 = vld [vmem:[#allocation6 + $0x18] sm:$0xff]  }
  0x5a   :  { %1698 = vmatprep.subr.bf16.mxu0 %v1899_v3  ;;  %v1929_v56 = vld [vmem:[#allocation13 + $0x30] sm:$0xff]   ;;  %v1930_v57 = vld [vmem:[#allocation13 + $0x28] sm:$0xff]   ;;  %v2290_v59 = vld [vmem:[#allocation6 + $0x20] sm:$0xff]  }
  0x5b   :  { %1727 = vmatpush3.bf16.msra.mxu1 %v1913_v17  ;;  %v1931_v60 = vld [vmem:[#allocation13 + $0x20] sm:$0xff]   ;;  %v1932_v61 = vld [vmem:[#allocation13 + $0x18] sm:$0xff]   ;;  %v2294_v62 = vld [vmem:[#allocation6 + $0x28] sm:$0xff]  }
  0x5c   :  { %1728 = vmatprep.subr.bf16.mxu1 %v1914_v18  ;;  %v2296_v63 = vld [vmem:[#allocation6 + $0x30] sm:$0xff]   ;;  %v1936_v1 = vld [vmem:[#allocation13 + $0x8] sm:$0xff]   ;;  %v2300_v2 = vld [vmem:[#allocation6 + $0x38] sm:$0xff]  }
  0x5d   :  { %1699 = vmatpush3.bf16.msra.mxu0 %v1899_v3  ;;  %v1934_v0 = vld [vmem:[#allocation13 + $0x10] sm:$0xff]   ;;  %v1938_v3 = vld [vmem:[#allocation13] sm:$0xff]  }
  0x5e   :  { %1700 = vmatprep.subr.bf16.mxu0 %v1900_v5  ;;  %v2306_v4 = vld [vmem:[%s2818_s6] ss:$0 sm:$0xff]  ;;  %s133_s6 = sld [smem:[#allocation2]] }
  0x5f   :  { %1729 = vmatpush3.bf16.msra.mxu1 %v1914_v18 }
  0x60   :  { %1730 = vmatprep.subr.bf16.mxu1 %v1915_v19 }
  0x61   :  { %1701 = vmatpush3.bf16.msra.mxu0 %v1900_v5 }
  0x62   :  { %1702 = vmatprep.subr.bf16.mxu0 %v1901_v6 }
  0x63   :  { %1731 = vmatpush3.bf16.msra.mxu1 %v1915_v19 }
  0x64   :  { %1732 = vmatprep.subr.bf16.mxu1 %v1916_v20  ;;  %s753_s30 = ssub.f32 1.0, %s133_s6 }
  0x65   :  { %1703 = vmatpush3.bf16.msra.mxu0 %v1901_v6 }
  0x66   :  { %1704 = vmatprep.subr.bf16.mxu0 %v1902_v7 }
  0x67   :  { %1733 = vmatpush3.bf16.msra.mxu1 %v1916_v20 }
  0x68   :  { %1734 = vmatprep.subr.bf16.mxu1 %v1917_v21 }
  0x69   :  { %1705 = vmatpush3.bf16.msra.mxu0 %v1902_v7 }
  0x6a   :  { %1706 = vmatprep.subr.bf16.mxu0 %v1903_v8 }
  0x6b   :  { %1735 = vmatpush3.bf16.msra.mxu1 %v1917_v21 }
  0x6c   :  { %1736 = vmatprep.subr.bf16.mxu1 %v1918_v22 }
  0x6d   :  { %1707 = vmatpush3.bf16.msra.mxu0 %v1903_v8 }
  0x6f   :  { %1737 = vmatpush3.bf16.msra.mxu1 %v1918_v22 }
  0x70   :  { %1709 = vmatmul.mubr.bf16.vlgmr.msra.gmra.mxu0 %v1905_v9  ;;  %1738 = vmatprep.subr.bf16.mxu1 %v1919_v23 }
  0x71   :  { %1712 = vmatprep.mubr.bf16.mxu0 %v1906_v10 }
  0x73   :  { %1739 = vmatpush3.bf16.msra.mxu1 %v1919_v23 }
  0x74   :  { %1788 = vmatprep.subr.bf16.mxu1 %v1933_v25 }
  0x76   :  { %1741 = vmatmul.mubr.bf16.vlgmr.msra.gmra.mxu1 %v1905_v9 }
  0x77   :  { %1744 = vmatprep.mubr.bf16.mxu1 %v1906_v10  ;;  %1789 = vmatpush3.bf16.msra.mxu1 %v1933_v25 }
  0x78   :  { %1713 = vmatmul.mubr.bf16.gmra.mxu0 %v1907_v11  ;;  %1790 = vmatprep.subr.bf16.mxu1 %v1935_v26 }
  0x79   :  { %1716 = vmatprep.mubr.bf16.mxu0 %v1908_v12 }
  0x7b   :  { %1791 = vmatpush3.bf16.msra.mxu1 %v1935_v26  ;;  %v1940_v26 = vld [vmem:[#allocation12 + $0x18] sm:$0xff]  }
  0x7c   :  { %1792 = vmatprep.subr.bf16.mxu1 %v1937_v27 }
  0x7e   :  { %1745 = vmatmul.mubr.bf16.gmra.mxu1 %v1907_v11 }
  0x7f   :  { %1748 = vmatprep.mubr.bf16.mxu1 %v1908_v12  ;;  %1793 = vmatpush3.bf16.msra.mxu1 %v1937_v27 }
  0x80   :  { %1717 = vmatmul.mubr.bf16.gmra.mxu0 %v1909_v13  ;;  %1794 = vmatprep.subr.bf16.mxu1 %v1939_v29 }
  0x81   :  { %1720 = vmatprep.mubr.bf16.mxu0 %v1910_v14 }
  0x83   :  { %1795 = vmatpush3.bf16.msra.mxu1 %v1939_v29 }
  0x84   :  { %1796 = vmatprep.subr.bf16.mxu1 %v1940_v26 }
  0x86   :  { %1749 = vmatmul.mubr.bf16.gmra.mxu1 %v1909_v13 }
  0x87   :  { %1752 = vmatprep.mubr.bf16.mxu1 %v1910_v14  ;;  %1797 = vmatpush3.bf16.msra.mxu1 %v1940_v26 }
  0x88   :  { %1721 = vmatmul.mubr.bf16.gmra.mxu0 %v1911_v15 }
  0x89   :  { %1772 = vmatprep.mubr.bf16.mxu0 %v2279_v24 }
  0x8e   :  { %1753 = vmatmul.mubr.bf16.gmra.mxu1 %v1911_v15 }
 0x130   :  { %v1710_v28 = vpop.f32.mrf.mxu0 }
 0x132   :  { %v313_v30 = vpop.f32.mrf.mxu0 }
 0x134   :  { %v1711_v31 = vpop.f32.mrf.mxu0 }
 0x135   :  { %v377_v51 = vpack.c.bf16 %v1711_v31, %v1710_v28 }
 0x136   :  { %v316_v32 = vpop.f32.mrf.mxu0  ;;  %v1742_v5 = vpop.f32.mrf.mxu1 }
 0x137   :  { %v376_v52 = vpack.c.bf16 %v316_v32, %v313_v30  ;;  %v2309_v6 = vadd.f32 %v1742_v5, %v2306_v4 }
 0x138   :  { %v1714_v33 = vpop.f32.mrf.mxu0  ;;  %v489_v7 = vpop.f32.mrf.mxu1 }
 0x139   :  { %v2312_v8 = vadd.f32 %v2306_v4, %v489_v7  ;;  %v554_v11 = vmax.f32 %v2309_v6, 0.0 }
 0x13a   :  { %v329_v34 = vpop.f32.mrf.mxu0  ;;  %v1743_v9 = vpop.f32.mrf.mxu1 }
 0x13b   :  { %v2315_v10 = vadd.f32 %v1743_v9, %v2306_v4  ;;  %v552_v13 = vmax.f32 %v2312_v8, 0.0 }
 0x13c   :  { %v1715_v35 = vpop.f32.mrf.mxu0  ;;  %v492_v12 = vpop.f32.mrf.mxu1 }
 0x13d   :  { %v379_v49 = vpack.c.bf16 %v1715_v35, %v1714_v33  ;;  %v555_v14 = vmax.f32 %v2315_v10, 0.0  ;;  %v2321_v15 = vadd.f32 %v2306_v4, %v492_v12 }
 0x13e   :  { %v332_v36 = vpop.f32.mrf.mxu0  ;;  %v1746_v16 = vpop.f32.mrf.mxu1 }
 0x13f   :  { %v378_v50 = vpack.c.bf16 %v332_v36, %v329_v34  ;;  %v553_v17 = vmax.f32 %v2321_v15, 0.0  ;;  %v965_v18 = vpack.c.bf16 %v555_v14, %v554_v11  ;;  %v2329_v19 = vadd.f32 %v1746_v16, %v2306_v4  ;;  %v1941_v34 = vld [vmem:[#allocation12 + $0x10] sm:$0xff]  }
 0x140   :  { %v1718_v37 = vpop.f32.mrf.mxu0  ;;  %v505_v20 = vpop.f32.mrf.mxu1  ;;  %1798 = vmatprep.subr.bf16.mxu1 %v1941_v34 }
 0x141   :  { %v964_v21 = vpack.c.bf16 %v553_v17, %v552_v13  ;;  %v2336_v22 = vadd.f32 %v2306_v4, %v505_v20  ;;  %v558_v27 = vmax.f32 %v2329_v19, 0.0  ;;  %1799 = vmatpush3.bf16.msra.mxu1 %v1941_v34 }
 0x142   :  { %v345_v38 = vpop.f32.mrf.mxu0  ;;  %v1747_v23 = vpop.f32.mrf.mxu1 }
 0x143   :  { %v2339_v25 = vadd.f32 %v1747_v23, %v2306_v4  ;;  %v556_v29 = vmax.f32 %v2336_v22, 0.0 }
 0x144   :  { %v1719_v39 = vpop.f32.mrf.mxu0  ;;  %v508_v28 = vpop.f32.mrf.mxu1 }
 0x145   :  { %v381_v47 = vpack.c.bf16 %v1719_v39, %v1718_v37  ;;  %v559_v30 = vmax.f32 %v2339_v25, 0.0  ;;  %v2345_v31 = vadd.f32 %v2306_v4, %v508_v28  ;;  %v1942_v39 = vld [vmem:[#allocation12 + $0x8] sm:$0xff]   ;;  %v2411_v28 = vstv %s753_s30 }
 0x146   :  { %v348_v40 = vpop.f32.mrf.mxu0  ;;  %v1750_v32 = vpop.f32.mrf.mxu1  ;;  %1800 = vmatprep.subr.bf16.mxu1 %v1942_v39  ;;  %v755_v6 = vmul.f32 %v2411_v28, %v552_v13  ;;  %v759_v25 = vmul.f32 %v2411_v28, %v556_v29 }
 0x147   :  { %v380_v48 = vpack.c.bf16 %v348_v40, %v345_v38  ;;  %v557_v33 = vmax.f32 %v2345_v31, 0.0  ;;  %v967_v35 = vpack.c.bf16 %v559_v30, %v558_v27  ;;  %v2357_v40 = vadd.f32 %v1750_v32, %v2306_v4  ;;  %1801 = vmatpush3.bf16.msra.mxu1 %v1942_v39 }
 0x148   :  { %v1722_v41 = vpop.f32.mrf.mxu0  ;;  %v521_v36 = vpop.f32.mrf.mxu1  ;;  %v2413_v32 = vstv %s133_s6 }
 0x149   :  { %v966_v37 = vpack.c.bf16 %v557_v33, %v556_v29  ;;  %v760_v19 = vmul.f32 %v2411_v28, %v557_v33 }
 0x14a   :  { %v361_v42 = vpop.f32.mrf.mxu0  ;;  %v1751_v38 = vpop.f32.mrf.mxu1 }
 0x14c   :  { %v1723_v43 = vpop.f32.mrf.mxu0 }
 0x14d   :  { %v383_v44 = vpack.c.bf16 %v1723_v43, %v1722_v41  ;;  %v524_v41 = vpop.f32.mrf.mxu1 }
 0x14e   :  { %v364_v45 = vpop.f32.mrf.mxu0  ;;  %v2363_v43 = vadd.f32 %v2306_v4, %v524_v41 }
 0x14f   :  { %v382_v46 = vpack.c.bf16 %v364_v45, %v361_v42  ;;  %1756 = vmatprep.subr.bf16.mxu0 %v383_v44  ;;  %v2360_v42 = vadd.f32 %v2306_v4, %v521_v36  ;;  %v2367_v45 = vadd.f32 %v1751_v38, %v2306_v4  ;;  %v757_v38 = vmul.f32 %v2411_v28, %v554_v11 }
 0x150   :  { %1757 = vmatpush3.bf16.msra.mxu0 %v383_v44  ;;  %v562_v44 = vmax.f32 %v2357_v40, 0.0  ;;  %v756_v11 = vmul.f32 %v2411_v28, %v553_v17  ;;  %v761_v17 = vmul.f32 %v2411_v28, %v558_v27 }
 0x151   :  { %1758 = vmatprep.subr.bf16.mxu0 %v382_v46 }
 0x152   :  { %v765_v22 = vmul.f32 %v2411_v28, %v562_v44 }
 0x154   :  { %1759 = vmatpush3.bf16.msra.mxu0 %v382_v46  ;;  %v1754_v46 = vpop.f32.mrf.mxu1 }
 0x155   :  { %1760 = vmatprep.subr.bf16.mxu0 %v381_v47 }
 0x158   :  { %1761 = vmatpush3.bf16.msra.mxu0 %v381_v47  ;;  %v560_v47 = vmax.f32 %v2360_v42, 0.0 }
 0x159   :  { %1762 = vmatprep.subr.bf16.mxu0 %v380_v48 }
 0x15c   :  { %1763 = vmatpush3.bf16.msra.mxu0 %v380_v48  ;;  %v561_v48 = vmax.f32 %v2363_v43, 0.0 }
 0x15d   :  { %1764 = vmatprep.subr.bf16.mxu0 %v379_v49 }
 0x160   :  { %1765 = vmatpush3.bf16.msra.mxu0 %v379_v49  ;;  %v563_v49 = vmax.f32 %v2367_v45, 0.0 }
 0x161   :  { %1766 = vmatprep.subr.bf16.mxu0 %v378_v50 }
 0x164   :  { %1767 = vmatpush3.bf16.msra.mxu0 %v378_v50  ;;  %v1943_v50 = vld [vmem:[#allocation12] sm:$0xff]  }
 0x165   :  { %1768 = vmatprep.subr.bf16.mxu0 %v377_v51  ;;  %1802 = vmatprep.subr.bf16.mxu1 %v1943_v50 }
 0x166   :  { %1803 = vmatpush3.bf16.msra.mxu1 %v1943_v50  ;;  %v758_v50 = vmul.f32 %v2411_v28, %v555_v14 }
 0x168   :  { %1769 = vmatpush3.bf16.msra.mxu0 %v377_v51  ;;  %v968_v51 = vpack.c.bf16 %v561_v48, %v560_v47 }
 0x169   :  { %1770 = vmatprep.subr.bf16.mxu0 %v376_v52 }
 0x16c   :  { %1771 = vmatpush3.bf16.msra.mxu0 %v376_v52  ;;  %v537_v52 = vpop.f32.mrf.mxu1 }
 0x16d   :  { %1820 = vmatprep.subr.bf16.mxu0 %v1928_v53 }
 0x16f   :  { %1773 = vmatmul.mubr.bf16.vlgmr.msra.gmra.mxu0 %v2282_v54 }
 0x170   :  { %1776 = vmatprep.mubr.bf16.mxu0 %v2284_v55  ;;  %1821 = vmatpush3.bf16.msra.mxu0 %v1928_v53  ;;  %v969_v53 = vpack.c.bf16 %v563_v49, %v562_v44 }
 0x171   :  { %1822 = vmatprep.subr.bf16.mxu0 %v1929_v56 }
 0x174   :  { %1823 = vmatpush3.bf16.msra.mxu0 %v1929_v56  ;;  %v1755_v56 = vpop.f32.mrf.mxu1 }
 0x175   :  { %1824 = vmatprep.subr.bf16.mxu0 %v1930_v57 }
 0x177   :  { %1777 = vmatmul.mubr.bf16.gmra.mxu0 %v2288_v58 }
 0x178   :  { %1780 = vmatprep.mubr.bf16.mxu0 %v2290_v59  ;;  %1825 = vmatpush3.bf16.msra.mxu0 %v1930_v57  ;;  %v2381_v57 = vadd.f32 %v1754_v46, %v2306_v4 }
 0x179   :  { %1826 = vmatprep.subr.bf16.mxu0 %v1931_v60 }
 0x17c   :  { %1827 = vmatpush3.bf16.msra.mxu0 %v1931_v60  ;;  %v540_v60 = vpop.f32.mrf.mxu1 }
 0x17d   :  { %1828 = vmatprep.subr.bf16.mxu0 %v1932_v61 }
 0x17f   :  { %1781 = vmatmul.mubr.bf16.gmra.mxu0 %v2294_v62 }
 0x180   :  { %1784 = vmatprep.mubr.bf16.mxu0 %v2296_v63  ;;  %1829 = vmatpush3.bf16.msra.mxu0 %v1932_v61  ;;  %v2384_v61 = vadd.f32 %v2306_v4, %v537_v52 }
 0x181   :  { %1830 = vmatprep.subr.bf16.mxu0 %v1934_v0 }
 0x182   :  { %v564_v5 = vmax.f32 %v2384_v61, 0.0 }
 0x184   :  { %1831 = vmatpush3.bf16.msra.mxu0 %v1934_v0  ;;  %v2387_v0 = vadd.f32 %v2306_v4, %v540_v60 }
 0x185   :  { %1832 = vmatprep.subr.bf16.mxu0 %v1936_v1 }
 0x186   :  { %v565_v7 = vmax.f32 %v2387_v0, 0.0 }
 0x187   :  { %1785 = vmatmul.mubr.bf16.gmra.mxu0 %v2300_v2 }
 0x188   :  { %1833 = vmatpush3.bf16.msra.mxu0 %v1936_v1  ;;  %1836 = vmatprep.mubr.bf16.mxu0 %v964_v21  ;;  %v566_v1 = vmax.f32 %v2381_v57, 0.0  ;;  %v970_v12 = vpack.c.bf16 %v565_v7, %v564_v5  ;;  %v767_v57 = vmul.f32 %v2411_v28, %v564_v5 }
 0x189   :  { %1834 = vmatprep.subr.bf16.mxu0 %v1938_v3 }
 0x18c   :  { %1835 = vmatpush3.bf16.msra.mxu0 %v1938_v3  ;;  %v2391_v3 = vadd.f32 %v1755_v56, %v2306_v4  ;;  %v2407_v4 = vld [vmem:[%s2816_s4] ss:$0 sm:$0xff]  ;;  %s1543_s4 = sld [smem:[#allocation2 + $0x1]] }
 0x18e   :  { %v567_v9 = vmax.f32 %v2391_v3, 0.0 }
 0x18f   :  { %1837 = vmatmul.mubr.bf16.vlgmr.msra.gmra.mxu0 %v965_v18 }
 0x190   :  { %1840 = vmatprep.mubr.bf16.mxu0 %v966_v37  ;;  %v971_v16 = vpack.c.bf16 %v567_v9, %v566_v1 }
 0x192   :  { %s1261_s13 = ssub.f32 1.0, %s1543_s4 }
 0x197   :  { %1841 = vmatmul.mubr.bf16.gmra.mxu0 %v967_v35 }
 0x198   :  { %1844 = vmatprep.mubr.bf16.mxu0 %v968_v51 }
 0x19f   :  { %1845 = vmatmul.mubr.bf16.gmra.mxu0 %v969_v53 }
 0x1a0   :  { %1848 = vmatprep.mubr.bf16.mxu0 %v970_v12 }
 0x1a7   :  { %1849 = vmatmul.mubr.bf16.gmra.mxu0 %v971_v16 }
 0x22f   :  { %v1774_v18 = vpop.f32.mrf.mxu0 }
 0x230   :  { %v666_v20 = vadd.f32 %v1774_v18, %v2407_v4 }
 0x231   :  { %v657_v21 = vpop.f32.mrf.mxu0 }
 0x232   :  { %v722_v23 = vmax.f32 %v666_v20, 0.0  ;;  %v658_v26 = vadd.f32 %v2407_v4, %v657_v21 }
 0x233   :  { %v1775_v34 = vpop.f32.mrf.mxu0 }
 0x234   :  { %v720_v35 = vmax.f32 %v658_v26, 0.0  ;;  %v669_v36 = vadd.f32 %v1775_v34, %v2407_v4  ;;  %v739_v39 = vmul.f32 %v2413_v32, %v722_v23 }
 0x235   :  { %v660_v37 = vpop.f32.mrf.mxu0 }
 0x236   :  { %v723_v41 = vmax.f32 %v669_v36, 0.0  ;;  %v661_v46 = vadd.f32 %v2407_v4, %v660_v37  ;;  %v737_v52 = vmul.f32 %v2413_v32, %v720_v35  ;;  %v773_v10 = vadd.f32 %v757_v38, %v739_v39 }
 0x237   :  { %v1778_v51 = vpop.f32.mrf.mxu0 }
 0x238   :  { %v740_v53 = vmul.f32 %v2413_v32, %v723_v41  ;;  %v721_v56 = vmax.f32 %v661_v46, 0.0  ;;  %v682_v60 = vadd.f32 %v1778_v51, %v2407_v4  ;;  %v771_v23 = vadd.f32 %v755_v6, %v737_v52 }
 0x239   :  { %v673_v12 = vpop.f32.mrf.mxu0 }
 0x23a   :  { %v774_v16 = vadd.f32 %v758_v50, %v740_v53  ;;  %v738_v14 = vmul.f32 %v2413_v32, %v721_v56  ;;  %v674_v18 = vadd.f32 %v2407_v4, %v673_v12  ;;  %v726_v20 = vmax.f32 %v682_v60, 0.0 }
 0x23b   :  { %v1779_v21 = vpop.f32.mrf.mxu0  ;;  %v762_v50 = vmul.f32 %v2411_v28, %v559_v30 }
 0x23c   :  { %v788_v26 = vpack.c.bf16 %v774_v16, %v773_v10  ;;  %v772_v34 = vadd.f32 %v756_v11, %v738_v14  ;;  %v724_v35 = vmax.f32 %v674_v18, 0.0  ;;  %v685_v8 = vadd.f32 %v1779_v21, %v2407_v4 }
 0x23d   :  { %v676_v13 = vpop.f32.mrf.mxu0  ;;  %v743_v37 = vmul.f32 %v2413_v32, %v726_v20 }
 0x23e   :  { %v677_v15 = vadd.f32 %v2407_v4, %v676_v13  ;;  %v787_v36 = vpack.c.bf16 %v772_v34, %v771_v23  ;;  %v727_v38 = vmax.f32 %v685_v8, 0.0  ;;  %v741_v51 = vmul.f32 %v2413_v32, %v724_v35 }
 0x23f   :  { %v1782_v39 = vpop.f32.mrf.mxu0  ;;  %v777_v60 = vadd.f32 %v761_v17, %v743_v37  ;;  %v764_v13 = vmul.f32 %v2411_v28, %v561_v48 }
 0x240   :  { %v725_v41 = vmax.f32 %v677_v15, 0.0  ;;  %v698_v46 = vadd.f32 %v1782_v39, %v2407_v4  ;;  %1804 = vmatprep.mubr.bf16.mxu1 %v787_v36  ;;  %v744_v52 = vmul.f32 %v2413_v32, %v727_v38  ;;  %v775_v16 = vadd.f32 %v759_v25, %v741_v51 }
 0x241   :  { %v689_v53 = vpop.f32.mrf.mxu0  ;;  %1805 = vmatmul.mubr.bf16.vlgmr.msra.gmra.mxu1 %v788_v26  ;;  %v766_v26 = vmul.f32 %v2411_v28, %v563_v49  ;;  %v763_v49 = vmul.f32 %v2411_v28, %v560_v47  ;;  %v769_v51 = vmul.f32 %v2411_v28, %v566_v1  ;;  %v770_v47 = vmul.f32 %v2411_v28, %v567_v9 }
 0x242   :  { %v742_v27 = vmul.f32 %v2413_v32, %v725_v41  ;;  %v690_v56 = vadd.f32 %v2407_v4, %v689_v53  ;;  %v778_v30 = vadd.f32 %v762_v50, %v744_v52  ;;  %v730_v6 = vmax.f32 %v698_v46, 0.0 }
 0x243   :  { %v1783_v11 = vpop.f32.mrf.mxu0  ;;  %v768_v1 = vmul.f32 %v2411_v28, %v565_v7 }
 0x244   :  { %v776_v12 = vadd.f32 %v760_v19, %v742_v27  ;;  %v701_v10 = vadd.f32 %v1783_v11, %v2407_v4  ;;  %v728_v14 = vmax.f32 %v690_v56, 0.0  ;;  %v790_v18 = vpack.c.bf16 %v778_v30, %v777_v60 }
 0x245   :  { %v692_v31 = vpop.f32.mrf.mxu0  ;;  %v747_v29 = vmul.f32 %v2413_v32, %v730_v6 }
 0x246   :  { %v731_v33 = vmax.f32 %v701_v10, 0.0  ;;  %v693_v20 = vadd.f32 %v2407_v4, %v692_v31  ;;  %v789_v23 = vpack.c.bf16 %v776_v12, %v775_v16  ;;  %v745_v40 = vmul.f32 %v2413_v32, %v728_v14 }
 0x247   :  { %v1786_v21 = vpop.f32.mrf.mxu0  ;;  %v781_v37 = vadd.f32 %v765_v22, %v747_v29 }
 0x248   :  { %v748_v34 = vmul.f32 %v2413_v32, %v731_v33  ;;  %v729_v35 = vmax.f32 %v693_v20, 0.0  ;;  %v714_v8 = vadd.f32 %v1786_v21, %v2407_v4  ;;  %1808 = vmatprep.mubr.bf16.mxu1 %v789_v23  ;;  %v779_v41 = vadd.f32 %v763_v49, %v745_v40 }
 0x249   :  { %v705_v44 = vpop.f32.mrf.mxu0  ;;  %1809 = vmatmul.mubr.bf16.gmra.mxu1 %v790_v18 }
 0x24a   :  { %v782_v15 = vadd.f32 %v766_v26, %v748_v34  ;;  %v746_v36 = vmul.f32 %v2413_v32, %v729_v35  ;;  %v734_v17 = vmax.f32 %v714_v8, 0.0  ;;  %v706_v45 = vadd.f32 %v2407_v4, %v705_v44 }
 0x24b   :  { %v1787_v38 = vpop.f32.mrf.mxu0 }
 0x24c   :  { %v780_v43 = vadd.f32 %v764_v13, %v746_v36  ;;  %v732_v39 = vmax.f32 %v706_v45, 0.0  ;;  %v717_v48 = vadd.f32 %v1787_v38, %v2407_v4  ;;  %v792_v50 = vpack.c.bf16 %v782_v15, %v781_v37 }
 0x24d   :  { %v708_v46 = vpop.f32.mrf.mxu0  ;;  %v751_v52 = vmul.f32 %v2413_v32, %v734_v17  ;;  %v2514_v38 = vstv %s1543_s4 }
 0x24e   :  { %v735_v53 = vmax.f32 %v717_v48, 0.0  ;;  %v709_v42 = vadd.f32 %v2407_v4, %v708_v46  ;;  %v791_v19 = vpack.c.bf16 %v780_v43, %v779_v41  ;;  %v749_v27 = vmul.f32 %v2413_v32, %v732_v39 }
 0x24f   :  { %v785_v4 = vadd.f32 %v769_v51, %v751_v52  ;;  %v1838_v40 = vpop.f32.mrf.mxu0 }
 0x250   :  { %v752_v56 = vmul.f32 %v2413_v32, %v735_v53  ;;  %v733_v25 = vmax.f32 %v709_v42, 0.0  ;;  %1812 = vmatprep.mubr.bf16.mxu1 %v791_v19  ;;  %v783_v9 = vadd.f32 %v767_v57, %v749_v27 }
 0x251   :  { %1813 = vmatmul.mubr.bf16.gmra.mxu1 %v792_v50  ;;  %v1077_v44 = vpop.f32.mrf.mxu0 }
 0x252   :  { %v786_v60 = vadd.f32 %v770_v47, %v752_v56  ;;  %v750_v3 = vmul.f32 %v2413_v32, %v733_v25 }
 0x253   :  { %v1839_v15 = vpop.f32.mrf.mxu0 }
 0x254   :  { %v784_v30 = vadd.f32 %v768_v1, %v750_v3  ;;  %v794_v6 = vpack.c.bf16 %v786_v60, %v785_v4 }
 0x255   :  { %v1080_v36 = vpop.f32.mrf.mxu0 }
 0x256   :  { %v793_v11 = vpack.c.bf16 %v784_v30, %v783_v9 }
 0x257   :  { %v1842_v17 = vpop.f32.mrf.mxu0 }
 0x258   :  { %1816 = vmatprep.mubr.bf16.mxu1 %v793_v11 }
 0x259   :  { %1817 = vmatmul.mubr.bf16.gmra.mxu1 %v794_v6  ;;  %v1093_v45 = vpop.f32.mrf.mxu0 }
 0x25a   :  { %1868 = vmatprep.mubr.bf16.mxu1 %v2279_v24 }
 0x301   :  { %v1806_v61 = vpop.f32.mrf.mxu1 }
 0x303   :  { %v893_v5 = vpop.f32.mrf.mxu1 }
 0x305   :  { %v1807_v12 = vpop.f32.mrf.mxu1 }
 0x306   :  { %v957_v8 = vpack.c.bf16 %v1807_v12, %v1806_v61 }
 0x307   :  { %v896_v10 = vpop.f32.mrf.mxu1 }
 0x308   :  { %v956_v13 = vpack.c.bf16 %v896_v10, %v893_v5 }
 0x309   :  { %v1810_v0 = vpop.f32.mrf.mxu1 }
 0x30b   :  { %v909_v16 = vpop.f32.mrf.mxu1 }
 0x30d   :  { %v1811_v7 = vpop.f32.mrf.mxu1 }
 0x30e   :  { %v959_v34 = vpack.c.bf16 %v1811_v7, %v1810_v0 }
 0x30f   :  { %v912_v28 = vpop.f32.mrf.mxu1 }
 0x310   :  { %v958_v35 = vpack.c.bf16 %v912_v28, %v909_v16 }
 0x311   :  { %v1814_v14 = vpop.f32.mrf.mxu1 }
 0x313   :  { %v925_v31 = vpop.f32.mrf.mxu1 }
 0x315   :  { %v1815_v32 = vpop.f32.mrf.mxu1 }
 0x316   :  { %v961_v24 = vpack.c.bf16 %v1815_v32, %v1814_v14 }
 0x317   :  { %v928_v18 = vpop.f32.mrf.mxu1 }
 0x318   :  { %v960_v26 = vpack.c.bf16 %v928_v18, %v925_v31 }
 0x319   :  { %v1818_v33 = vpop.f32.mrf.mxu1 }
 0x31b   :  { %v941_v20 = vpop.f32.mrf.mxu1 }
 0x31d   :  { %v1819_v22 = vpop.f32.mrf.mxu1 }
 0x31e   :  { %v963_v29 = vpack.c.bf16 %v1819_v22, %v1818_v33 }
 0x31f   :  { %v944_v21 = vpop.f32.mrf.mxu1 }
 0x320   :  { %v962_v23 = vpack.c.bf16 %v944_v21, %v941_v20  ;;  %1852 = vmatprep.subr.bf16.mxu1 %v963_v29 }
 0x321   :  { %1853 = vmatpush3.bf16.msra.mxu1 %v963_v29 }
 0x322   :  { %1854 = vmatprep.subr.bf16.mxu1 %v962_v23 }
 0x325   :  { %1855 = vmatpush3.bf16.msra.mxu1 %v962_v23 }
 0x326   :  { %1856 = vmatprep.subr.bf16.mxu1 %v961_v24 }
 0x329   :  { %1857 = vmatpush3.bf16.msra.mxu1 %v961_v24 }
 0x32a   :  { %1858 = vmatprep.subr.bf16.mxu1 %v960_v26 }
 0x32d   :  { %1859 = vmatpush3.bf16.msra.mxu1 %v960_v26 }
 0x32e   :  { %1860 = vmatprep.subr.bf16.mxu1 %v959_v34 }
 0x331   :  { %1861 = vmatpush3.bf16.msra.mxu1 %v959_v34 }
 0x332   :  { %1862 = vmatprep.subr.bf16.mxu1 %v958_v35 }
 0x335   :  { %1863 = vmatpush3.bf16.msra.mxu1 %v958_v35 }
 0x336   :  { %1864 = vmatprep.subr.bf16.mxu1 %v957_v8 }
 0x339   :  { %1865 = vmatpush3.bf16.msra.mxu1 %v957_v8 }
 0x33a   :  { %1866 = vmatprep.subr.bf16.mxu1 %v956_v13 }
 0x33d   :  { %1867 = vmatpush3.bf16.msra.mxu1 %v956_v13 }
 0x340   :  { %1869 = vmatmul.mubr.bf16.vlgmr.msra.gmra.mxu1 %v2282_v54  ;;  %v1843_v54 = vpop.f32.mrf.mxu0 }
 0x341   :  { %1872 = vmatprep.mubr.bf16.mxu1 %v2284_v55  ;;  %v2504_v55 = vld [vmem:[%s2822_s10] ss:$0 sm:$0xff] }
 0x342   :  { %v1096_v49 = vpop.f32.mrf.mxu0  ;;  %v1078_v39 = vadd.f32 %v2504_v55, %v1077_v44  ;;  %v1089_v46 = vadd.f32 %v1839_v15, %v2504_v55  ;;  %v1081_v42 = vadd.f32 %v2504_v55, %v1080_v36  ;;  %v1102_v4 = vadd.f32 %v1842_v17, %v2504_v55 }
 0x343   :  { %v1094_v28 = vadd.f32 %v2504_v55, %v1093_v45  ;;  %v1105_v14 = vadd.f32 %v1843_v54, %v2504_v55  ;;  %v1097_v22 = vadd.f32 %v2504_v55, %v1096_v49 }
 0x348   :  { %1873 = vmatmul.mubr.bf16.gmra.mxu1 %v2288_v58  ;;  %v1295_v58 = vlaneseq }
 0x349   :  { %1876 = vmatprep.mubr.bf16.mxu1 %v2290_v59  ;;  %v1846_v59 = vpop.f32.mrf.mxu0 }
 0x34a   :  { %v2516_v43 = vand.u32 127, %v1295_v58  ;;  %v1118_v35 = vadd.f32 %v1846_v59, %v2504_v55 }
 0x34b   :  { %v2519_v48 = vpop.f32.mrf.mxu0 }
 0x34c   :  { %vm1297_vm0 = vcmp.lt.s32.totalorder %v2516_v43, 8 }
 0x34d   :  { %v1847_v27 = vpop.f32.mrf.mxu0 }
 0x34f   :  { %v1112_v5 = vpop.f32.mrf.mxu0 }
 0x350   :  { %1877 = vmatmul.mubr.bf16.gmra.mxu1 %v2294_v62  ;;  %v2509_v62 = vld [vmem:[%s2820_s8] ss:$0 sm:$0xff]  ;;  %s2177_s8 = smov [#allocation15]  }
 0x351   :  { %1880 = vmatprep.mubr.bf16.mxu1 %v2296_v63  ;;  %v1086_v63 = vadd.f32 %v1838_v40, %v2504_v55  ;;  %v1850_v21 = vpop.f32.mrf.mxu0  ;;  %s1527_s10 = sshll.u32 %s2177_s8, 4  ;;  %s1528_s10 = int_to_ptr.vmem [resolvable:$true] %s1527_s10 }
 0x352   :  { %s2136_s16 = scalar_lea.vmem %s1528_s10, 2048  ;;  %p2141_p3 = scmp.lt.s32.totalorder %s1528_s10, %s1528_s10 }
 0x353   :  { %v1125_v54 = vpop.f32.mrf.mxu0  ;;  %p2137_p2 = scmp.ne.s32.totalorder %s1528_s10, %s2136_s16  ;;  %p2142_p4 = scmp.lt.s32.totalorder %s2136_s16, %s2136_s16 }
 0x355   :  { %p2143_p5 = por %p2142_p4, %p2141_p3 }
 0x357   :  { %p2144_p6 = pnand %p2143_p5, %p2137_p2 }
 0x358   :  { %1881 = vmatmul.mubr.bf16.gmra.mxu1 %v2300_v2  ;;  %v2512_v2 = vstv %s1261_s13 }
 0x359   :  { %v1265_v51 = vmul.f32 %v2512_v2, %v1086_v63  ;;  %v1263_v47 = vmul.f32 %v2512_v2, %v1078_v39  ;;  %v1266_v1 = vmul.f32 %v2512_v2, %v1089_v46  ;;  %v1264_v11 = vmul.f32 %v2512_v2, %v1081_v42 }
 0x35a   :  { %v1269_v7 = vmul.f32 %v2512_v2, %v1102_v4  ;;  %v1267_v13 = vmul.f32 %v2512_v2, %v1094_v28  ;;  %v1270_v40 = vmul.f32 %v2512_v2, %v1105_v14  ;;  %v1268_v36 = vmul.f32 %v2512_v2, %v1097_v22 }
 0x35b   :  { %v1110_v39 = vadd.f32 %v2504_v55, %v2519_v48  ;;  %v1113_v42 = vadd.f32 %v2504_v55, %v1112_v5 }
 0x400   :  { %v1870_v37 = vpop.f32.mrf.mxu1 }
 0x401   :  { %v1190_v41 = vadd.f32 %v1870_v37, %v2509_v62  ;;  %v1273_v37 = vmul.f32 %v2512_v2, %v1118_v35 }
 0x402   :  { %v1181_v50 = vpop.f32.mrf.mxu1 }
 0x403   :  { %v1247_v52 = vmul.f32 %v2514_v38, %v1190_v41  ;;  %v1182_v53 = vadd.f32 %v2509_v62, %v1181_v50  ;;  %v1121_v41 = vadd.f32 %v1847_v27, %v2504_v55 }
 0x404   :  { %v1871_v19 = vpop.f32.mrf.mxu1 }
 0x405   :  { %v1245_v56 = vmul.f32 %v2514_v38, %v1182_v53  ;;  %v1193_v25 = vadd.f32 %v1871_v19, %v2509_v62  ;;  %v2531_v57 = vadd.f32 %v1265_v51, %v1247_v52 }
 0x406   :  { %v1184_v60 = vpop.f32.mrf.mxu1 }
 0x407   :  { %v1248_v3 = vmul.f32 %v2514_v38, %v1193_v25  ;;  %v1185_v9 = vadd.f32 %v2509_v62, %v1184_v60  ;;  %v1300_v30 = vsel %vm1297_vm0, %v2531_v57, -inf  ;;  %v2540_v6 = vadd.f32 %v1263_v47, %v1245_v56  ;;  %v1851_v47 = vpop.f32.mrf.mxu0 }
 0x408   :  { %1318 = vmax.xlane.f32.xlu1 %v1300_v30  ;;  %v1874_v61 = vpop.f32.mrf.mxu1  ;;  %v1274_v60 = vmul.f32 %v2512_v2, %v1121_v41 }
 0x409   :  { %v1246_v12 = vmul.f32 %v2514_v38, %v1185_v9  ;;  %v1206_v10 = vadd.f32 %v1874_v61, %v2509_v62  ;;  %v1298_v0 = vsel %vm1297_vm0, %v2540_v6, -inf  ;;  %v2548_v16 = vadd.f32 %v1266_v1, %v1248_v3 }
 0x40a   :  { %v1197_v31 = vpop.f32.mrf.mxu1  ;;  %1314 = vmax.xlane.f32.xlu0 %v1298_v0  ;;  %v1271_v1 = vmul.f32 %v2512_v2, %v1110_v39  ;;  %v1126_v61 = vadd.f32 %v2504_v55, %v1125_v54 }
 0x40b   :  { %v1251_v32 = vmul.f32 %v2514_v38, %v1206_v10  ;;  %v1198_v18 = vadd.f32 %v2509_v62, %v1197_v31  ;;  %v1301_v33 = vsel %vm1297_vm0, %v2548_v16, -inf  ;;  %v2558_v20 = vadd.f32 %v1264_v11, %v1246_v12  ;;  %v1128_v10 = vpop.f32.mrf.mxu0 }
 0x40c   :  { %1320 = vmax.xlane.f32.xlu1 %v1301_v33  ;;  %v1875_v29 = vpop.f32.mrf.mxu1  ;;  %v1272_v11 = vmul.f32 %v2512_v2, %v1113_v42  ;;  %v1134_v31 = vadd.f32 %v1850_v21, %v2504_v55 }
 0x40d   :  { %v1249_v23 = vmul.f32 %v2514_v38, %v1198_v18  ;;  %v1209_v24 = vadd.f32 %v1875_v29, %v2509_v62  ;;  %v1299_v26 = vsel %vm1297_vm0, %v2558_v20, -inf  ;;  %v2566_v34 = vadd.f32 %v1269_v7, %v1251_v32 }
 0x40e   :  { %v1200_v8 = vpop.f32.mrf.mxu1  ;;  %1316 = vmax.xlane.f32.xlu0 %v1299_v26  ;;  %v1275_v29 = vmul.f32 %v2512_v2, %v1126_v61 }
 0x40f   :  { %v1252_v44 = vmul.f32 %v2514_v38, %v1209_v24  ;;  %v1201_v15 = vadd.f32 %v2509_v62, %v1200_v8  ;;  %v1304_v45 = vsel %vm1297_vm0, %v2566_v34, -inf  ;;  %v2581_v63 = vadd.f32 %v1267_v13, %v1249_v23 }
 0x410   :  { %v1878_v17 = vpop.f32.mrf.mxu1  ;;  %v1129_v23 = vadd.f32 %v2504_v55, %v1128_v10  ;;  %v1277_v13 = vmul.f32 %v2512_v2, %v1134_v31 }
 0x411   :  { %v1250_v49 = vmul.f32 %v2514_v38, %v1201_v15  ;;  %v1222_v58 = vadd.f32 %v1878_v17, %v2509_v62  ;;  %v2579_v59 = vadd.f32 %v1270_v40, %v1252_v44  ;;  %v1302_v56 = vsel %vm1297_vm0, %v2581_v63, -inf }
 0x412   :  { %v1213_v46 = vpop.f32.mrf.mxu1  ;;  %1326 = vmax.xlane.f32.xlu0 %v1304_v45  ;;  %v1137_v44 = vadd.f32 %v1851_v47, %v2504_v55  ;;  %v1276_v45 = vmul.f32 %v2512_v2, %v1129_v23 }
 0x413   :  { %v1255_v50 = vmul.f32 %v2514_v38, %v1222_v58  ;;  %v1214_v51 = vadd.f32 %v2509_v62, %v1213_v46  ;;  %v1305_v52 = vsel %vm1297_vm0, %v2579_v59, -inf  ;;  %v2592_v53 = vadd.f32 %v1268_v36, %v1250_v49 }
 0x414   :  { %1328 = vmax.xlane.f32.xlu1 %v1305_v52  ;;  %v1879_v19 = vpop.f32.mrf.mxu1 }
 0x415   :  { %v1253_v48 = vmul.f32 %v2514_v38, %v1214_v51  ;;  %v1225_v27 = vadd.f32 %v1879_v19, %v2509_v62  ;;  %v2600_v25 = vadd.f32 %v1273_v37, %v1255_v50  ;;  %v1303_v30 = vsel %vm1297_vm0, %v2592_v53, -inf }
 0x416   :  { %v1216_v4 = vpop.f32.mrf.mxu1  ;;  %1322 = vmax.xlane.f32.xlu0 %v1302_v56 }
 0x417   :  { %v1256_v3 = vmul.f32 %v2514_v38, %v1225_v27  ;;  %v1217_v9 = vadd.f32 %v2509_v62, %v1216_v4  ;;  %v1308_v12 = vsel %vm1297_vm0, %v2600_v25, -inf  ;;  %v2618_v14 = vadd.f32 %v1271_v1, %v1253_v48 }
 0x418   :  { %v1882_v5 = vpop.f32.mrf.mxu1  ;;  %1324 = vmax.xlane.f32.xlu1 %v1303_v30 }
 0x419   :  { %v1254_v0 = vmul.f32 %v2514_v38, %v1217_v9  ;;  %v1238_v7 = vadd.f32 %v1882_v5, %v2509_v62  ;;  %v2616_v28 = vadd.f32 %v1274_v60, %v1256_v3  ;;  %v1306_v8 = vsel %vm1297_vm0, %v2618_v14, -inf }
 0x41a   :  { %v1229_v32 = vpop.f32.mrf.mxu1  ;;  %1334 = vmax.xlane.f32.xlu0 %v1308_v12 }
 0x41b   :  { %v1230_v18 = vadd.f32 %v2509_v62, %v1229_v32  ;;  %v1309_v33 = vsel %vm1297_vm0, %v2616_v28, -inf  ;;  %v2625_v22 = vadd.f32 %v1272_v11, %v1254_v0  ;;  %v1259_v26 = vmul.f32 %v2514_v38, %v1238_v7 }
 0x41c   :  { %v1883_v24 = vpop.f32.mrf.mxu1  ;;  %1336 = vmax.xlane.f32.xlu1 %v1309_v33 }
 0x41d   :  { %v1257_v21 = vmul.f32 %v2514_v38, %v1230_v18  ;;  %v1241_v35 = vadd.f32 %v1883_v24, %v2509_v62  ;;  %v1307_v36 = vsel %vm1297_vm0, %v2625_v22, -inf  ;;  %v2649_v55 = vadd.f32 %v1277_v13, %v1259_v26 }
 0x41e   :  { %v1232_v40 = vpop.f32.mrf.mxu1  ;;  %1330 = vmax.xlane.f32.xlu0 %v1306_v8 }
 0x41f   :  { %v1233_v15 = vadd.f32 %v2509_v62, %v1232_v40  ;;  %v2641_v17 = vadd.f32 %v1275_v29, %v1257_v21  ;;  %v1260_v54 = vmul.f32 %v2514_v38, %v1241_v35  ;;  %v1278_v62 = vmul.f32 %v2512_v2, %v1137_v44 }
 0x420   :  { %1332 = vmax.xlane.f32.xlu1 %v1307_v36  ;;  %v1312_v41 = vsel %vm1297_vm0, %v2649_v55, -inf }
 0x421   :  { %v1258_v49 = vmul.f32 %v2514_v38, %v1233_v15  ;;  %v1310_v58 = vsel %vm1297_vm0, %v2641_v17, -inf  ;;  %v2660_v38 = vadd.f32 %v1278_v62, %v1260_v54 }
 0x422   :  { %1338 = vmax.xlane.f32.xlu0 %v1310_v58 }
 0x423   :  { %v2652_v37 = vadd.f32 %v1276_v45, %v1258_v49  ;;  %v1313_v46 = vsel %vm1297_vm0, %v2660_v38, -inf }
 0x425   :  { %v1311_v39 = vsel %vm1297_vm0, %v2652_v37, -inf }
 0x426   :  { %1340 = vmax.xlane.f32.xlu1 %v1311_v39  ;;  %1342 = vmax.xlane.f32.xlu0 %v1312_v41 }
 0x42a   :  { %1344 = vmax.xlane.f32.xlu1 %v1313_v46 }
 0x491   :  { %v1319_v2 = vpop.xlane.xlu1 %1318 }
 0x492   :  { %v2666_v50 = vsub.f32 %v2531_v57, %v1319_v2 }
 0x493   :  { %v1315_v51 = vpop.xlane.xlu0 %1314 }
 0x494   :  { %v1366_v52 = vmul.f32 1.442695, %v2666_v50  ;;  %v2670_v42 = vsub.f32 %v2540_v6, %v1315_v51 }
 0x495   :  { %v1321_v19 = vpop.xlane.xlu1 %1320 }
 0x496   :  { %1944 = vpow2.f32 %v1366_v52  ;;  %v1362_v47 = vmul.f32 1.442695, %v2670_v42  ;;  %v2674_v48 = vsub.f32 %v2548_v16, %v1321_v19 }
 0x497   :  { %v1317_v27 = vpop.xlane.xlu0 %1316 }
 0x498   :  { %1946 = vpow2.f32 %v1362_v47  ;;  %v1368_v56 = vmul.f32 1.442695, %v2674_v48  ;;  %v2678_v57 = vsub.f32 %v2558_v20, %v1317_v27 }
 0x49a   :  { %1948 = vpow2.f32 %v1368_v56  ;;  %v1364_v1 = vmul.f32 1.442695, %v2678_v57 }
 0x49b   :  { %v1327_v4 = vpop.xlane.xlu0 %1326 }
 0x49c   :  { %1950 = vpow2.f32 %v1364_v1  ;;  %v2682_v6 = vsub.f32 %v2566_v34, %v1327_v4 }
 0x49d   :  { %v1329_v60 = vpop.xlane.xlu1 %1328 }
 0x49e   :  { %v1374_v3 = vmul.f32 1.442695, %v2682_v6  ;;  %v2686_v16 = vsub.f32 %v2579_v59, %v1329_v60 }
 0x49f   :  { %v1323_v9 = vpop.xlane.xlu0 %1322 }
 0x4a0   :  { %1952 = vpow2.f32 %v1374_v3  ;;  %v1376_v30 = vmul.f32 1.442695, %v2686_v16  ;;  %v2690_v20 = vsub.f32 %v2581_v63, %v1323_v9 }
 0x4a1   :  { %v1325_v11 = vpop.xlane.xlu1 %1324 }
 0x4a2   :  { %1954 = vpow2.f32 %v1376_v30  ;;  %v1370_v61 = vmul.f32 1.442695, %v2690_v20  ;;  %v2694_v34 = vsub.f32 %v2592_v53, %v1325_v11 }
 0x4a3   :  { %v1945_v5 = vpop.eup %1944  ;;  %v1335_v12 = vpop.xlane.xlu0 %1334 }
 0x4a4   :  { %1956 = vpow2.f32 %v1370_v61  ;;  %v1372_v59 = vmul.f32 1.442695, %v2694_v34  ;;  %v2698_v10 = vsub.f32 %v2600_v25, %v1335_v12  ;;  %v1396_v0 = vsel %vm1297_vm0, %v1945_v5, 0.0 }
 0x4a5   :  { %v1947_v63 = vpop.eup %1946  ;;  %v1337_v7 = vpop.xlane.xlu1 %1336  ;;  %1414 = vadd.xlane.f32.xlu0 %v1396_v0 }
 0x4a6   :  { %1958 = vpow2.f32 %v1372_v59  ;;  %v1382_v31 = vmul.f32 1.442695, %v2698_v10  ;;  %v2704_v53 = vsub.f32 %v2616_v28, %v1337_v7  ;;  %v1394_v33 = vsel %vm1297_vm0, %v1947_v63, 0.0 }
 0x4a7   :  { %v1949_v32 = vpop.eup %1948  ;;  %v1331_v18 = vpop.xlane.xlu0 %1330 }
 0x4a8   :  { %1960 = vpow2.f32 %v1382_v31  ;;  %v1384_v25 = vmul.f32 1.442695, %v2704_v53  ;;  %v2710_v29 = vsub.f32 %v2618_v14, %v1331_v18  ;;  %v1397_v23 = vsel %vm1297_vm0, %v1949_v32, 0.0 }
 0x4a9   :  { %v1951_v24 = vpop.eup %1950  ;;  %1416 = vadd.xlane.f32.xlu1 %v1397_v23  ;;  %v1333_v26 = vpop.xlane.xlu1 %1332  ;;  %1410 = vadd.xlane.f32.xlu0 %v1394_v33 }
 0x4aa   :  { %1962 = vpow2.f32 %v1384_v25  ;;  %v1378_v28 = vmul.f32 1.442695, %v2710_v29  ;;  %v2716_v21 = vsub.f32 %v2625_v22, %v1333_v26  ;;  %v1395_v13 = vsel %vm1297_vm0, %v1951_v24, 0.0 }
 0x4ab   :  { %v1339_v35 = vpop.xlane.xlu0 %1338 }
 0x4ac   :  { %1964 = vpow2.f32 %v1378_v28  ;;  %v1380_v8 = vmul.f32 1.442695, %v2716_v21  ;;  %v2720_v14 = vsub.f32 %v2641_v17, %v1339_v35 }
 0x4ad   :  { %v1953_v40 = vpop.eup %1952  ;;  %1412 = vadd.xlane.f32.xlu1 %v1395_v13 }
 0x4ae   :  { %1966 = vpow2.f32 %v1380_v8  ;;  %v1386_v44 = vmul.f32 1.442695, %v2720_v14  ;;  %v1400_v15 = vsel %vm1297_vm0, %v1953_v40, 0.0 }
 0x4af   :  { %v1955_v22 = vpop.eup %1954  ;;  %v1341_v36 = vpop.xlane.xlu1 %1340  ;;  %1422 = vadd.xlane.f32.xlu0 %v1400_v15 }
 0x4b0   :  { %v1343_v45 = vpop.xlane.xlu0 %1342  ;;  %1968 = vpow2.f32 %v1386_v44  ;;  %v2728_v54 = vsub.f32 %v2652_v37, %v1341_v36  ;;  %v1401_v49 = vsel %vm1297_vm0, %v1955_v22, 0.0 }
 0x4b1   :  { %v2731_v17 = vsub.f32 %v2649_v55, %v1343_v45  ;;  %v1957_v58 = vpop.eup %1956  ;;  %1424 = vadd.xlane.f32.xlu1 %v1401_v49 }
 0x4b2   :  { %v1388_v62 = vmul.f32 1.442695, %v2728_v54  ;;  %v1398_v41 = vsel %vm1297_vm0, %v1957_v58, 0.0 }
 0x4b3   :  { %v1390_v39 = vmul.f32 1.442695, %v2731_v17  ;;  %v1959_v46 = vpop.eup %1958  ;;  %v1345_v2 = vpop.xlane.xlu1 %1344  ;;  %1418 = vadd.xlane.f32.xlu0 %v1398_v41 }
 0x4b4   :  { %1970 = vpow2.f32 %v1388_v62  ;;  %v2740_v37 = vsub.f32 %v2660_v38, %v1345_v2  ;;  %v1399_v55 = vsel %vm1297_vm0, %v1959_v46, 0.0 }
 0x4b5   :  { %v1961_v51 = vpop.eup %1960  ;;  %1972 = vpow2.f32 %v1390_v39  ;;  %1420 = vadd.xlane.f32.xlu1 %v1399_v55 }
 0x4b6   :  { %v1392_v52 = vmul.f32 1.442695, %v2740_v37  ;;  %v1404_v19 = vsel %vm1297_vm0, %v1961_v51, 0.0 }
 0x4b7   :  { %v1963_v47 = vpop.eup %1962  ;;  %1430 = vadd.xlane.f32.xlu0 %v1404_v19 }
 0x4b8   :  { %1974 = vpow2.f32 %v1392_v52  ;;  %v1405_v27 = vsel %vm1297_vm0, %v1963_v47, 0.0 }
 0x4b9   :  { %v1965_v56 = vpop.eup %1964  ;;  %1432 = vadd.xlane.f32.xlu1 %v1405_v27 }
 0x4ba   :  { %v1402_v38 = vsel %vm1297_vm0, %v1965_v56, 0.0 }
 0x4bb   :  { %v1967_v1 = vpop.eup %1966  ;;  %1426 = vadd.xlane.f32.xlu0 %v1402_v38 }
 0x4bc   :  { %v1403_v4 = vsel %vm1297_vm0, %v1967_v1, 0.0 }
 0x4bd   :  { %v1969_v60 = vpop.eup %1968  ;;  %1428 = vadd.xlane.f32.xlu1 %v1403_v4 }
 0x4be   :  { %v1406_v3 = vsel %vm1297_vm0, %v1969_v60, 0.0 }
 0x4bf   :  { %1434 = vadd.xlane.f32.xlu0 %v1406_v3 }
 0x4c1   :  { %v1971_v9 = vpop.eup %1970 }
 0x4c2   :  { %v1973_v30 = vpop.eup %1972  ;;  %v1407_v11 = vsel %vm1297_vm0, %v1971_v9, 0.0 }
 0x4c3   :  { %1436 = vadd.xlane.f32.xlu1 %v1407_v11  ;;  %v1408_v61 = vsel %vm1297_vm0, %v1973_v30, 0.0 }
 0x4c4   :  { %1438 = vadd.xlane.f32.xlu0 %v1408_v61 }
 0x4c5   :  { %v1975_v5 = vpop.eup %1974 }
 0x4c6   :  { %v1409_v12 = vsel %vm1297_vm0, %v1975_v5, 0.0 }
 0x4c7   :  { %1440 = vadd.xlane.f32.xlu1 %v1409_v12 }
 0x52e   :  { %v1415_v59 = vpop.xlane.xlu0 %1414 }
 0x52f   :  { %1976 = vlog2.f32 %v1415_v59 }
 0x532   :  { %v1417_v0 = vpop.xlane.xlu1 %1416  ;;  %v1411_v63 = vpop.xlane.xlu0 %1410 }
 0x533   :  { %1978 = vlog2.f32 %v1417_v0 }
 0x534   :  { %1980 = vlog2.f32 %v1411_v63 }
 0x536   :  { %v1413_v7 = vpop.xlane.xlu1 %1412 }
 0x537   :  { %1982 = vlog2.f32 %v1413_v7 }
 0x538   :  { %v1423_v31 = vpop.xlane.xlu0 %1422 }
 0x539   :  { %1984 = vlog2.f32 %v1423_v31 }
 0x53a   :  { %v1425_v32 = vpop.xlane.xlu1 %1424 }
 0x53b   :  { %1986 = vlog2.f32 %v1425_v32 }
 0x53c   :  { %v1977_v18 = vpop.eup %1976  ;;  %v1419_v33 = vpop.xlane.xlu0 %1418 }
 0x53d   :  { %v1447_v25 = vmul.f32 0.6931472, %v1977_v18  ;;  %1988 = vlog2.f32 %v1419_v33 }
 0x53e   :  { %v1421_v23 = vpop.xlane.xlu1 %1420 }
 0x53f   :  { %v1476_v24 = vsub.f32 %v2666_v50, %v1447_v25  ;;  %1990 = vlog2.f32 %v1421_v23 }
 0x540   :  { %v1979_v26 = vpop.eup %1978  ;;  %v1431_v28 = vpop.xlane.xlu0 %1430 }
 0x541   :  { %v1981_v35 = vpop.eup %1980  ;;  %v1492_v8 = vsel %vm1297_vm0, %v1476_v24, 0.0  ;;  %v1449_v13 = vmul.f32 0.6931472, %v1979_v26  ;;  %1992 = vlog2.f32 %v1431_v28 }
 0x542   :  { %1508 = vst [vmem:[#allocation15 + $0x10] sm:$0xff] %v1492_v8  ;;  %v1443_v40 = vmul.f32 0.6931472, %v1981_v35  ;;  %v1433_v44 = vpop.xlane.xlu1 %1432 }
 0x543   :  { %v1477_v15 = vsub.f32 %v2674_v48, %v1449_v13  ;;  %1994 = vlog2.f32 %v1433_v44 }
 0x544   :  { %v1983_v22 = vpop.eup %1982  ;;  %v1474_v36 = vsub.f32 %v2670_v42, %v1443_v40  ;;  %v1427_v45 = vpop.xlane.xlu0 %1426 }
 0x545   :  { %v1493_v50 = vsel %vm1297_vm0, %v1477_v15, 0.0  ;;  %v1445_v49 = vmul.f32 0.6931472, %v1983_v22  ;;  %1996 = vlog2.f32 %v1427_v45 }
 0x546   :  { %v1985_v58 = vpop.eup %1984  ;;  %1509 = vst [vmem:[#allocation15 + $0x18] sm:$0xff] %v1493_v50  ;;  %v1490_v62 = vsel %vm1297_vm0, %v1474_v36, 0.0  ;;  %v1429_v39 = vpop.xlane.xlu1 %1428 }
 0x547   :  { %1506 = vst [vmem:[#allocation15] sm:$0xff] %v1490_v62  ;;  %v1475_v41 = vsub.f32 %v2678_v57, %v1445_v49  ;;  %v1455_v48 = vmul.f32 0.6931472, %v1985_v58  ;;  %1998 = vlog2.f32 %v1429_v39 }
 0x548   :  { %v1987_v46 = vpop.eup %1986  ;;  %v1435_v2 = vpop.xlane.xlu0 %1434 }
 0x549   :  { %v1491_v42 = vsel %vm1297_vm0, %v1475_v41, 0.0  ;;  %v1480_v55 = vsub.f32 %v2682_v6, %v1455_v48  ;;  %v1457_v51 = vmul.f32 0.6931472, %v1987_v46  ;;  %2000 = vlog2.f32 %v1435_v2 }
 0x54a   :  { %v1989_v52 = vpop.eup %1988  ;;  %1507 = vst [vmem:[#allocation15 + $0x8] sm:$0xff] %v1491_v42 }
 0x54b   :  { %v1496_v19 = vsel %vm1297_vm0, %v1480_v55, 0.0  ;;  %v1481_v47 = vsub.f32 %v2686_v16, %v1457_v51  ;;  %v1451_v27 = vmul.f32 0.6931472, %v1989_v52 }
 0x54c   :  { %v1991_v57 = vpop.eup %1990  ;;  %1512 = vst [vmem:[#allocation15 + $0x30] sm:$0xff] %v1496_v19  ;;  %v1437_v56 = vpop.xlane.xlu1 %1436 }
 0x54d   :  { %v1497_v38 = vsel %vm1297_vm0, %v1481_v47, 0.0  ;;  %v1478_v1 = vsub.f32 %v2690_v20, %v1451_v27  ;;  %v1453_v4 = vmul.f32 0.6931472, %v1991_v57  ;;  %2002 = vlog2.f32 %v1437_v56  ;;  %v1439_v6 = vpop.xlane.xlu0 %1438 }
 0x54e   :  { %v1993_v60 = vpop.eup %1992  ;;  %1513 = vst [vmem:[#allocation15 + $0x38] sm:$0xff] %v1497_v38  ;;  %2004 = vlog2.f32 %v1439_v6 }
 0x54f   :  { %v1494_v3 = vsel %vm1297_vm0, %v1478_v1, 0.0  ;;  %v1479_v16 = vsub.f32 %v2694_v34, %v1453_v4  ;;  %v1463_v9 = vmul.f32 0.6931472, %v1993_v60 }
 0x550   :  { %v1995_v30 = vpop.eup %1994  ;;  %1510 = vst [vmem:[#allocation15 + $0x20] sm:$0xff] %v1494_v3  ;;  %v1441_v11 = vpop.xlane.xlu1 %1440 }
 0x551   :  { %v1495_v61 = vsel %vm1297_vm0, %v1479_v16, 0.0  ;;  %v1484_v20 = vsub.f32 %v2698_v10, %v1463_v9  ;;  %v1465_v5 = vmul.f32 0.6931472, %v1995_v30  ;;  %2006 = vlog2.f32 %v1441_v11 }
 0x552   :  { %v1997_v12 = vpop.eup %1996  ;;  %1511 = vst [vmem:[#allocation15 + $0x28] sm:$0xff] %v1495_v61 }
 0x553   :  { %v1500_v59 = vsel %vm1297_vm0, %v1484_v20, 0.0  ;;  %v1485_v0 = vsub.f32 %v2704_v53, %v1465_v5  ;;  %v1459_v63 = vmul.f32 0.6931472, %v1997_v12 }
 0x554   :  { %v1999_v34 = vpop.eup %1998  ;;  %1516 = vst [vmem:[#allocation15 + $0x50] sm:$0xff] %v1500_v59 }
 0x555   :  { %v1501_v7 = vsel %vm1297_vm0, %v1485_v0, 0.0  ;;  %v1482_v31 = vsub.f32 %v2710_v29, %v1459_v63  ;;  %v1461_v32 = vmul.f32 0.6931472, %v1999_v34 }
 0x556   :  { %v2001_v18 = vpop.eup %2000  ;;  %1517 = vst [vmem:[#allocation15 + $0x58] sm:$0xff] %v1501_v7 }
 0x557   :  { %v1498_v10 = vsel %vm1297_vm0, %v1482_v31, 0.0  ;;  %v1483_v33 = vsub.f32 %v2716_v21, %v1461_v32  ;;  %v1467_v25 = vmul.f32 0.6931472, %v2001_v18 }
 0x558   :  { %1514 = vst [vmem:[#allocation15 + $0x40] sm:$0xff] %v1498_v10 }
 0x559   :  { %v1499_v53 = vsel %vm1297_vm0, %v1483_v33, 0.0  ;;  %v1486_v23 = vsub.f32 %v2720_v14, %v1467_v25 }
 0x55a   :  { %v2003_v24 = vpop.eup %2002  ;;  %1515 = vst [vmem:[#allocation15 + $0x48] sm:$0xff] %v1499_v53 }
 0x55b   :  { %v2005_v26 = vpop.eup %2004  ;;  %v1502_v29 = vsel %vm1297_vm0, %v1486_v23, 0.0  ;;  %v1469_v28 = vmul.f32 0.6931472, %v2003_v24 }
 0x55c   :  { %1518 = vst [vmem:[#allocation15 + $0x60] sm:$0xff] %v1502_v29  ;;  %v1471_v35 = vmul.f32 0.6931472, %v2005_v26 }
 0x55d   :  { %v1487_v8 = vsub.f32 %v2728_v54, %v1469_v28 }
 0x55e   :  { %v2007_v13 = vpop.eup %2006  ;;  %v1488_v21 = vsub.f32 %v2731_v17, %v1471_v35 }
 0x55f   :  { %v1503_v40 = vsel %vm1297_vm0, %v1487_v8, 0.0  ;;  %v1473_v44 = vmul.f32 0.6931472, %v2007_v13 }
 0x560   :  { %1519 = vst [vmem:[#allocation15 + $0x68] sm:$0xff] %v1503_v40  ;;  %v1504_v14 = vsel %vm1297_vm0, %v1488_v21, 0.0 }
 0x561   :  { %1520 = vst [vmem:[#allocation15 + $0x70] sm:$0xff] %v1504_v14  ;;  %v1489_v15 = vsub.f32 %v2740_v37, %v1473_v44 }
 0x563   :  { %v1505_v54 = vsel %vm1297_vm0, %v1489_v15, 0.0 }
 0x564   :  { %1521 = vst [vmem:[#allocation15 + $0x78] sm:$0xff] %v1505_v54 }
 0x565   :  { %2147 = shalt.err (!%p2144_p6)
}
 0x566   :  { %s2178_s5 = smov 128   ;;  %s2179_s17 = smov 8  }
 0x567   :  { %1533 = dma.vmem_to_hbm [thread:$0]  %s1528_s10, 2048, %s2823_s11, [#allocation4], %s2178_s5, %s2178_s5, %s2179_s17  }
 0x568   :  { %2166 = dma.done.wait [#allocation4], 2048  }
 0x569   :  { %2167 = vsyncadd [#allocation4], 4294965248 }
 0x56a   :  { %1537 = vsyncpa [#allocation3], 1 }
 0x56b   :  { %1538 = vsyncpa [#allocation8], 1 }
 0x56c   :  { %1539 = vsyncpa [#allocation11], 1 }
 0x56d   :  { %1540 = vsyncpa [#allocation14], 1 }
 0x56e   :  { %1541 = vsyncpa [#allocation4], 1 }
 0x56f   :  { %1542 = vsyncpa [#allocation5], 1 }

</bundles_post_ra>
